<compile_context>
chip_gen: v6e
topology: v6e:2x2x1
jax: 0.10.0
libtpu: 0.0.40
codegen_flags: <defaults>
</compile_context>

<pallas_src>
import math

import jax
import jax.numpy as jnp
from jax.experimental import pallas as pl
from jax.experimental.pallas import tpu as pltpu

_LANE = 128
_SUBLANE = 8
_NEG_SLOPE = 0.01  # nn.LeakyReLU default negative_slope


def _round_up(x, m):
    return (x + m - 1) // m * m


# ---------------------------------------------------------------------------
# Fused kernel: (x @ W1^T + b1) -> LeakyReLU -> (@ W2^T + b2) -> Sigmoid
# ---------------------------------------------------------------------------
def _latent_dis_kernel(x_ref, w1_ref, b1_ref, w2_ref, b2_ref, o_ref):
    # x_ref : (tm, Dp)   w1_ref: (Dp, Hp)   b1_ref: (1, Hp)
    # w2_ref: (Hp, OP)   b2_ref: (1, OP)    o_ref : (tm, OP)
    h = jnp.dot(x_ref[...], w1_ref[...], preferred_element_type=jnp.float32)
    h = h + b1_ref[...]
    h = jnp.where(h > 0, h, _NEG_SLOPE * h)                       # LeakyReLU
    y = jnp.dot(h.astype(w2_ref.dtype), w2_ref[...],
                preferred_element_type=jnp.float32)
    y = y + b2_ref[...]
    o_ref[...] = (1.0 / (1.0 + jnp.exp(-y))).astype(o_ref.dtype)  # Sigmoid


# ---------------------------------------------------------------------------
# Wrapper: PyTorch-layout weights in, (B, 1) sigmoid scores out
# ---------------------------------------------------------------------------
def latent_dis_forward(x, w1, b1, w2, b2, *, compute_dtype=jnp.bfloat16):
    """
    x : (B, D)                      latent vectors
    w1: (1500, D), b1: (1500,)      first nn.Linear (PyTorch layout)
    w2: (1, 1500),  b2: (1,)        second nn.Linear
    Returns (B, 1) float32 = sigmoid(fc(x)).
    """
    B, D = x.shape
    H = w1.shape[0]
    assert w1.shape == (H, D) and b1.shape == (H,)
    assert w2.shape == (1, H) and b2.shape == (1,)

    Dp = _round_up(D, _LANE)
    Hp = _round_up(H, _LANE)
    OP = _LANE  # lane-dense padded output width (real width = 1)

    # Row tile: at least 2 grid steps where possible (v7x dual TC), cap at 512.
    Bp8 = _round_up(B, _SUBLANE)
    if Bp8 <= _SUBLANE:
        tm = _SUBLANE
    else:
        tm = min(512, max(_SUBLANE, (Bp8 // 2) // _SUBLANE * _SUBLANE))
    Bp = _round_up(Bp8, tm)

    f32 = jnp.float32

    # One-time pad + cast (layout plumbing in HBM; zero padding is inert:
    # padded D/H rows-cols contribute 0, padded batch rows / output cols are
    # sliced off below).
    x_p = jnp.zeros((Bp, Dp), compute_dtype).at[:B, :D].set(x.astype(compute_dtype))
    w1t = jnp.zeros((Dp, Hp), compute_dtype).at[:D, :H].set(w1.T.astype(compute_dtype))
    b1p = jnp.zeros((1, Hp), f32).at[0, :H].set(b1.astype(f32))
    w2t = jnp.zeros((Hp, OP), compute_dtype).at[:H, :1].set(w2.T.astype(compute_dtype))
    b2p = jnp.zeros((1, OP), f32).at[0, :1].set(b2.astype(f32))

    grid = (Bp // tm,)
    bytes_el = jnp.dtype(compute_dtype).itemsize
    cost = pl.CostEstimate(
        flops=2 * Bp * Dp * Hp + 2 * Bp * Hp * OP,
        transcendentals=Bp * OP,
        bytes_accessed=(Bp * Dp + Dp * Hp + Hp * OP) * bytes_el
        + (Hp + OP) * 4 + Bp * OP * 4,
    )

    out = pl.pallas_call(
        _latent_dis_kernel,
        out_shape=jax.ShapeDtypeStruct((Bp, OP), f32),
        grid=grid,
        in_specs=[
            pl.BlockSpec((tm, Dp), lambda i: (i, 0)),   # row tile of latents
            pl.BlockSpec((Dp, Hp), lambda i: (0, 0)),   # W1^T (resident)
            pl.BlockSpec((1, Hp), lambda i: (0, 0)),    # b1
            pl.BlockSpec((Hp, OP), lambda i: (0, 0)),   # W2^T, lane-padded
            pl.BlockSpec((1, OP), lambda i: (0, 0)),    # b2
        ],
        out_specs=pl.BlockSpec((tm, OP), lambda i: (i, 0)),  # lane-dense stores
        compiler_params=pltpu.CompilerParams(
            dimension_semantics=("parallel",),
        ),
        cost_estimate=cost,
    )(x_p, w1t, b1p, w2t, b2p)

    # Return exactly the layout the consumer needs: (B, 1).
    return out[:B, :1]


# ---------------------------------------------------------------------------
# Pure-JAX reference (for correctness check)
# ---------------------------------------------------------------------------
def _reference(x, w1, b1, w2, b2):
    h = x @ w1.T + b1
    h = jnp.where(h > 0, h, _NEG_SLOPE * h)
    y = h @ w2.T + b2
    return 1.0 / (1.0 + jnp.exp(-y))


if __name__ == "__main__":
    latent_size, hidden, batch = 128, 1500, 16

    key = jax.random.PRNGKey(0)
    kx, k1, k2, k3, k4 = jax.random.split(key, 5)
    x = jax.random.normal(kx, (batch, latent_size), dtype=jnp.float32)

    # PyTorch nn.Linear default init: U(-1/sqrt(fan_in), 1/sqrt(fan_in))
    lim1 = 1.0 / math.sqrt(latent_size)
    w1 = jax.random.uniform(k1, (hidden, latent_size), jnp.float32, -lim1, lim1)
    b1 = jax.random.uniform(k2, (hidden,), jnp.float32, -lim1, lim1)
    lim2 = 1.0 / math.sqrt(hidden)
    w2 = jax.random.uniform(k3, (1, hidden), jnp.float32, -lim2, lim2)
    b2 = jax.random.uniform(k4, (1,), jnp.float32, -lim2, lim2)

    y_ref = _reference(x, w1, b1, w2, b2)

    # f32 compute path (tight correctness check)
    y32 = latent_dis_forward(x, w1, b1, w2, b2, compute_dtype=jnp.float32)
    y32 = jax.block_until_ready(y32)
    assert y32.shape == (batch, 1), y32.shape
    assert jnp.allclose(y32, y_ref, rtol=1e-3, atol=1e-3), "f32 path mismatch"

    # bf16-matmul / f32-accumulate path (default, per perf review)
    ybf = latent_dis_forward(x, w1, b1, w2, b2, compute_dtype=jnp.bfloat16)
    ybf = jax.block_until_ready(ybf)
    assert ybf.shape == (batch, 1), ybf.shape
    assert jnp.allclose(ybf, y_ref, rtol=5e-3, atol=5e-3), "bf16 path mismatch"

    print("KERNEL_OK")
</pallas_src>

<mosaic_0001>
module attributes {stable_mosaic.version = 11 : i64} {
  func.func @_latent_dis_kernel(%arg0: i32, %arg1: memref<8x128xf32, #tpu.memory_space<vmem>>, %arg2: memref<128x1536xf32, #tpu.memory_space<vmem>>, %arg3: memref<1x1536xf32, #tpu.memory_space<vmem>>, %arg4: memref<1536x128xf32, #tpu.memory_space<vmem>>, %arg5: memref<1x128xf32, #tpu.memory_space<vmem>>, %arg6: memref<8x128xf32, #tpu.memory_space<vmem>>) attributes {dimension_semantics = [#tpu.dimension_semantics<parallel>], iteration_bounds = array<i64: 2>, scalar_prefetch = 0 : i64, scratch_operands = 0 : i64, tpu.core_type = #tpu.core_type<tc>, window_params = [{transform_indices = @transform_0, window_bounds = array<i64: 8, 128>}, {pipeline_mode = #tpu.pipeline_mode<synchronous>, transform_indices = @transform_1, window_bounds = array<i64: 128, 1536>}, {pipeline_mode = #tpu.pipeline_mode<synchronous>, transform_indices = @transform_2, window_bounds = array<i64: 1, 1536>}, {pipeline_mode = #tpu.pipeline_mode<synchronous>, transform_indices = @transform_3, window_bounds = array<i64: 1536, 128>}, {pipeline_mode = #tpu.pipeline_mode<synchronous>, transform_indices = @transform_4, window_bounds = array<i64: 1, 128>}, {transform_indices = @transform_5, window_bounds = array<i64: 8, 128>}]} {
    %c0 = arith.constant 0 : index
    %c0_0 = arith.constant 0 : index
    %0 = vector.load %arg1[%c0, %c0_0] : memref<8x128xf32, #tpu.memory_space<vmem>>, vector<8x128xf32>
    %c0_1 = arith.constant 0 : index
    %c0_2 = arith.constant 0 : index
    %1 = vector.load %arg2[%c0_1, %c0_2] : memref<128x1536xf32, #tpu.memory_space<vmem>>, vector<128x1536xf32>
    %cst = arith.constant dense<0.000000e+00> : vector<8x1536xf32>
    %2 = tpu.matmul %0, %1, %cst {dimension_numbers = #tpu.dot_dimension_numbers<[1], [0], [0], [1], [0, 0, 1, 1], [], []>} : vector<8x128xf32>, vector<128x1536xf32>, vector<8x1536xf32> -> vector<8x1536xf32>
    %c0_3 = arith.constant 0 : index
    %c0_4 = arith.constant 0 : index
    %3 = vector.load %arg3[%c0_3, %c0_4] : memref<1x1536xf32, #tpu.memory_space<vmem>>, vector<1x1536xf32>
    %4 = vector.broadcast %3 : vector<1x1536xf32> to vector<8x1536xf32>
    %5 = arith.addf %2, %4 : vector<8x1536xf32>
    %cst_5 = arith.constant 0.000000e+00 : f32
    %6 = vector.broadcast %cst_5 : f32 to vector<8x1536xf32>
    %7 = arith.cmpf ogt, %5, %6 : vector<8x1536xf32>
    %cst_6 = arith.constant 0.00999999977 : f32
    %8 = vector.broadcast %cst_6 : f32 to vector<8x1536xf32>
    %9 = arith.mulf %8, %5 : vector<8x1536xf32>
    %10 = arith.select %7, %5, %9 : vector<8x1536xi1>, vector<8x1536xf32>
    %c0_7 = arith.constant 0 : index
    %c0_8 = arith.constant 0 : index
    %11 = vector.load %arg4[%c0_7, %c0_8] : memref<1536x128xf32, #tpu.memory_space<vmem>>, vector<1536x128xf32>
    %cst_9 = arith.constant dense<0.000000e+00> : vector<8x128xf32>
    %12 = tpu.matmul %10, %11, %cst_9 {dimension_numbers = #tpu.dot_dimension_numbers<[1], [0], [0], [1], [0, 0, 1, 1], [], []>} : vector<8x1536xf32>, vector<1536x128xf32>, vector<8x128xf32> -> vector<8x128xf32>
    %c0_10 = arith.constant 0 : index
    %c0_11 = arith.constant 0 : index
    %13 = vector.load %arg5[%c0_10, %c0_11] : memref<1x128xf32, #tpu.memory_space<vmem>>, vector<1x128xf32>
    %14 = vector.broadcast %13 : vector<1x128xf32> to vector<8x128xf32>
    %15 = arith.addf %12, %14 : vector<8x128xf32>
    %cst_12 = arith.constant 0.000000e+00 : f32
    %16 = vector.broadcast %cst_12 : f32 to vector<8x128xf32>
    %17 = arith.subf %16, %15 : vector<8x128xf32>
    %18 = math.exp %17 : vector<8x128xf32>
    %cst_13 = arith.constant 1.000000e+00 : f32
    %19 = vector.broadcast %cst_13 : f32 to vector<8x128xf32>
    %20 = arith.addf %19, %18 : vector<8x128xf32>
    %cst_14 = arith.constant 1.000000e+00 : f32
    %21 = vector.broadcast %cst_14 : f32 to vector<8x128xf32>
    %22 = arith.divf %21, %20 : vector<8x128xf32>
    %c0_15 = arith.constant 0 : index
    %c0_16 = arith.constant 0 : index
    %23 = vector.load %arg6[%c0_15, %c0_16] : memref<8x128xf32, #tpu.memory_space<vmem>>, vector<8x128xf32>
    tpu.vector_store %arg6[%c0_15, %c0_16], %22 {strides = array<i32>} : memref<8x128xf32, #tpu.memory_space<vmem>>, vector<8x128xf32>,
    return
  }
  func.func @transform_0(%arg0: i32) -> (i32, i32) {
    %c0_i32 = arith.constant 0 : i32
    %c0_i32_0 = arith.constant 0 : i32
    return %arg0, %c0_i32 : i32, i32
  }
  func.func @transform_1(%arg0: i32) -> (i32, i32) {
    %c0_i32 = arith.constant 0 : i32
    %c0_i32_0 = arith.constant 0 : i32
    %c0_i32_1 = arith.constant 0 : i32
    return %c0_i32, %c0_i32_0 : i32, i32
  }
  func.func @transform_2(%arg0: i32) -> (i32, i32) {
    %c0_i32 = arith.constant 0 : i32
    %c0_i32_0 = arith.constant 0 : i32
    %c0_i32_1 = arith.constant 0 : i32
    return %c0_i32, %c0_i32_0 : i32, i32
  }
  func.func @transform_3(%arg0: i32) -> (i32, i32) {
    %c0_i32 = arith.constant 0 : i32
    %c0_i32_0 = arith.constant 0 : i32
    %c0_i32_1 = arith.constant 0 : i32
    return %c0_i32, %c0_i32_0 : i32, i32
  }
  func.func @transform_4(%arg0: i32) -> (i32, i32) {
    %c0_i32 = arith.constant 0 : i32
    %c0_i32_0 = arith.constant 0 : i32
    %c0_i32_1 = arith.constant 0 : i32
    return %c0_i32, %c0_i32_0 : i32, i32
  }
  func.func @transform_5(%arg0: i32) -> (i32, i32) {
    %c0_i32 = arith.constant 0 : i32
    %c0_i32_0 = arith.constant 0 : i32
    return %arg0, %c0_i32 : i32, i32
  }
}

</mosaic_0001>

<bundles_post_ra>
// kernel: tpu_custom_call.1
= control target key start
LH: loop header
LB: loop body
LE: loop exit
PB: predicated region body
PF: predicated region fallthrough
CT: control target
= control target key end

     0   :  { %10 = vsyncpa [#allocation3], 0  ;;  %s2522_s0 = inlined_call_operand.hbm [shape: f32[16,128], index: 0, kind: input, shape index: {}]   ;;  %s2523_s1 = inlined_call_operand.hbm [shape: f32[128,1536], index: 1, kind: input, shape index: {}]   ;;  %s2524_s2 = inlined_call_operand.hbm [shape: f32[1,1536], index: 2, kind: input, shape index: {}]   ;;  %s2525_s3 = inlined_call_operand.hbm [shape: f32[1536,128], index: 3, kind: input, shape index: {}]   ;;  %s2526_s4 = inlined_call_operand.vmem [shape: f32[1,128], index: 4, kind: input, shape index: {}]   ;;  %s2527_s5 = inlined_call_operand.hbm [shape: f32[16,128], index: 5, kind: output, shape index: {}]  }
   0x1   :  { %12 = vsyncpa [#allocation3 + $0x1], 0 }
   0x2   :  { %13 = vsyncpa [#allocation6], 0 }
   0x3   :  { %14 = vsyncpa [#allocation9], 0 }
   0x4   :  { %15 = vsyncpa [#allocation4], 0 }
   0x5   :  { %17 = vsyncpa [#allocation4 + $0x1], 0  ;;  %s2275_s18 = smov 0   ;;  %s2277_s19 = smov 0  }
   0x6   :  { %s2279_s20 = smov 0   ;;  %s2281_s21 = smov 0  }
   0x7 LB: > { %s2296_s22 = sadd.s32 4294967295, %s2233_s21   ;;  %s1740_s23 = sadd.s32 4294967294, %s2233_s21   ;;  %s2233_s21 = sphi %s2281_s21, %s2551_s21   ;;  %s2229_s20 = sphi %s2279_s20, %s2550_s20   ;;  %s2225_s19 = sphi %s2277_s19, %s2549_s19   ;;  %s2221_s18 = sphi %s2275_s18, %s2548_s18  }
   0x8   : > { %p43_p0 = scmp.ne.s32.totalorder %s2225_s19, %s2221_s18  ;;  %p2528_p1 = scmp.eq.s32.totalorder %s2296_s22, 0 }
   0x9   : > { %p157_p3 = scmp.eq.s32.totalorder %s1740_s23, 1  ;;  %p1741_p5 = scmp.ge.s32.totalorder %s2233_s21, 1 }
   0xa   : > { %p2305_p4 = por %p2528_p1, %p43_p0  ;;  %p164_p7 = scmp.lt.s32.totalorder %s2233_s21, 3 }
   0xb   : > { %p2310_p6 = por %p157_p3, %p43_p0  ;;  %s2235_s27 = smov [#allocation5]  }
   0xc   : > { %s2532_s24 = scalar_select %p2305_p4, 1, 0 }
   0xd   : > { %s2533_s25 = scalar_select %p2310_p6, 1, 0 }
   0xe   : > { %p2315_p8 = pnand %p1741_p5, %p164_p7  ;;  %s176_s28 = sshll.u32 %s2235_s27, 4  ;;  %s177_s28 = int_to_ptr.vmem [resolvable:$true] %s176_s28 }
   0xf   : > { %s2236_s30 = smov [#allocation7]   ;;  %s2237_s7 = smov [#allocation8]  }
  0x10   : > { %s2534_s26 = scalar_select %p2315_p8, 1, 0 }
  0x11   : > { %p1985_p9 = pneg %p2315_p8  ;;  %s190_s6 = sshll.u32 %s2236_s30, 4  ;;  %s191_s6 = int_to_ptr.vmem [resolvable:$true] %s190_s6 }
  0x12   : > { %s200_s8 = sshll.u32 %s2237_s7, 4  ;;  %s2066_s9 = scalar_lea.vmem %s177_s28, 24576  ;;  %s201_s8 = int_to_ptr.vmem [resolvable:$true] %s200_s8 }
  0x13   : > { %p2324_p11 = pnand %p1985_p9, %p2528_p1  ;;  %p2067_p13 = scmp.ne.s32.totalorder %s177_s28, %s2066_s9 }
  0x14   : > { %p2074_p5 = scmp.lt.s32.totalorder %s177_s28, %s177_s28  ;;  %p2075_p7 = scmp.lt.s32.totalorder %s2066_s9, %s2066_s9 }
  0x15   : > { %p2057_p12 = pneg %p2324_p11 }
  0x16   : > { %p2076_p9 = por %p2075_p7, %p2074_p5 }
  0x17   : > { %p2069_p0 = pnand %p2067_p13, %p2057_p12 }
  0x19   : > { %p2070_p3 = pneg %p2069_p0 }
  0x1b   : > { %p2077_p10 = pnand %p2076_p9, %p2070_p3 }
  0x1d   : > { %2080 = shalt.err (!%p2077_p10)
}
  0x1e   : > { %s2238_s10 = smov 1536   ;;  %s2239_s11 = smov 96  }
  0x1f   : > { %1988 = dma.hbm_to_vmem [thread:$0]  (!%p2324_p11), %s2523_s1, 24576, %s177_s28, [#allocation6], %s2238_s10, %s2238_s10, %s2239_s11  }
  0x20   : > { %s2092_s14 = scalar_lea.vmem %s191_s6, 192  ;;  %p2100_p2 = scmp.lt.s32.totalorder %s191_s6, %s191_s6 }
  0x21   : > { %p2093_p1 = scmp.ne.s32.totalorder %s191_s6, %s2092_s14  ;;  %p2101_p6 = scmp.lt.s32.totalorder %s2092_s14, %s2092_s14 }
  0x23   : > { %p2095_p13 = pnand %p2093_p1, %p2057_p12  ;;  %p2102_p5 = por %p2101_p6, %p2100_p2 }
  0x25   : > { %p2096_p0 = pneg %p2095_p13 }
  0x27   : > { %p2103_p3 = pnand %p2102_p5, %p2096_p0 }
  0x29   : > { %2106 = shalt.err (!%p2103_p3)
}
  0x2a   : > { %1991 = dma.hbm_to_vmem [thread:$0]  (!%p2324_p11), %s2524_s2, 192, %s191_s6, [#allocation6]  }
  0x2b   : > { %s2118_s17 = scalar_lea.vmem %s201_s8, 24576  ;;  %p2126_p9 = scmp.lt.s32.totalorder %s201_s8, %s201_s8 }
  0x2c   : > { %p2119_p10 = scmp.ne.s32.totalorder %s201_s8, %s2118_s17  ;;  %p2127_p13 = scmp.lt.s32.totalorder %s2118_s17, %s2118_s17 }
  0x2e   : > { %p2121_p7 = pnand %p2119_p10, %p2057_p12  ;;  %p2128_p4 = por %p2127_p13, %p2126_p9 }
  0x30   : > { %p2122_p1 = pneg %p2121_p7 }
  0x32   : > { %p2129_p2 = pnand %p2128_p4, %p2122_p1 }
  0x34   : > { %2132 = shalt.err (!%p2129_p2)
}
  0x35   : > { %s2240_s23 = smov 128   ;;  %s2241_s27 = smov 8  }
  0x36   : > { %1994 = dma.hbm_to_vmem [thread:$0]  (!%p2324_p11), %s2525_s3, 24576, %s201_s8, [#allocation9], %s2240_s23, %s2240_s23, %s2241_s27  }
  0x37   : > { %s2355_s6 = sadd.s32 1, %s2233_s21   ;;  %s30_s9 = sadd.s32 1, %s2229_s20 }
  0x38   : > { %s27_s7 = ssub.s32 %s2233_s21, %s2355_s6  ;;  %p37_p6 = scmp.ne.s32.totalorder %s2229_s20, %s2225_s19 }
  0x39   : > { %p28_p4 = scmp.eq.s32.totalorder %s27_s7, 0  ;;  %p38_p12 = scmp.eq.s32.totalorder %s2233_s21, 0 }
  0x3a   : > { %p2006_p0 = scmp.lt.s32.totalorder %s2233_s21, 2  ;;  %p2536_p3 = scmp.eq.s32.totalorder %s2296_s22, 1 }
  0x3b   : > { %s2365_s10 = scalar_select %p28_p4, %s2229_s20, %s30_s9  }
  0x3c   : > { %p39_p5 = por %p38_p12, %p37_p6  ;;  %p2369_p10 = por %p2536_p3, %p37_p6 }
  0x3d   : > { %s217_s29 = sand.u32 1, %s2229_s20   ;;  %s1747_s12 = sshll.u32 %s2233_s21, 7 }
  0x3e   : > { %s2537_s11 = scalar_select %p2369_p10, 1, 0 }
  0x3f   : > { %s1746_s8 = sshll.u32 %s217_s29, 3  ;;  %s2378_s15 = scalar_lea.hbm %s2522_s0, %s1747_s12 }
  0x40   : > { %s221_s16 = scalar_lea.vmem [#allocation2], %s1746_s8  ;;  %p2380_p11 = pnand %p2006_p0, %p39_p5 }
  0x41   : > { %s228_s17 = sshll.u32 %s221_s16, 4  ;;  %s218_s27 = scalar_lea.sflag [#allocation3], %s217_s29  ;;  %s229_s17 = int_to_ptr.vmem [resolvable:$true] %s228_s17 }
  0x42   : > { %s2133_s28 = scalar_lea.hbm %s2378_s15, 128  ;;  %p2135_p1 = pneg %p2380_p11 }
  0x43   : > { %p2134_p7 = scmp.ne.s32.totalorder %s2378_s15, %s2133_s28  ;;  %s2138_s9 = scalar_lea.hbm %s2522_s0, 256 }
  0x44   : > { %p2139_p2 = scmp.lt.s32.totalorder %s2378_s15, %s2522_s0  ;;  %p2140_p4 = scmp.lt.s32.totalorder %s2138_s9, %s2133_s28 }
  0x45   : > { %p2136_p9 = pnand %p2135_p1, %p2134_p7 }
  0x46   : > { %p2141_p6 = por %p2140_p4, %p2139_p2 }
  0x47   : > { %p2137_p13 = pneg %p2136_p9 }
  0x49   : > { %p2142_p12 = pnand %p2141_p6, %p2137_p13 }
  0x4b   : > { %2145 = shalt.err (!%p2142_p12)
}
  0x4c   : > { %s2146_s13 = scalar_lea.vmem %s229_s17, 128  ;;  %s2242_s29 = smov [#allocation2]  }
  0x4d   : > { %p2147_p0 = scmp.ne.s32.totalorder %s229_s17, %s2146_s13  ;;  %s2151_s14 = sshll.u32 %s2242_s29, 4  ;;  %s2152_s14 = int_to_ptr.vmem [resolvable:$false] %s2151_s14 }
  0x4e   : > { %s2153_s16 = scalar_lea.vmem %s2152_s14, 256  ;;  %p2154_p7 = scmp.lt.s32.totalorder %s229_s17, %s2152_s14 }
  0x4f   : > { %p2149_p5 = pnand %p2147_p0, %p2135_p1  ;;  %p2155_p9 = scmp.lt.s32.totalorder %s2153_s16, %s2146_s13 }
  0x51   : > { %p2150_p3 = pneg %p2149_p5  ;;  %p2156_p10 = por %p2155_p9, %p2154_p7 }
  0x53   : > { %p2157_p8 = pnand %p2156_p10, %p2150_p3 }
  0x55   : > { %2160 = shalt.err (!%p2157_p8)
}
  0x56   : > { %1998 = dma.hbm_to_vmem [thread:$0]  (!%p2380_p11), %s2378_s15, 128, %s229_s17, %s218_s27  }
  0x57   : > { %p2539_p13 = scmp.ne.s32.totalorder %s2534_s26, 0 }
  0x58   : > { %s2401_s28 = sand.u32 (!%p2539_p13), 1, %s2225_s19   ;;  %p2540_p8 = scmp.ne.s32.totalorder (!%p2539_p13), %s2532_s24, 0 }
  0x59   : > { %237 = sbr.rel (%p2539_p13) target bundleno = 652 (0x28c), region = 40  ;;  %s1749_s30 = sshll.u32 (!%p2539_p13), %s2401_s28, 3 }
  0x5a   : > { %s240_s7 = scalar_lea.sflag (!%p2539_p13), [#allocation3], %s2401_s28  ;;  %s2407_s9 = scalar_lea.vmem (!%p2539_p13), [#allocation2], %s1749_s30 }
  0x5e   : > { %2204 = dma.done.wait (%p2540_p8), %s240_s7, 128  }
  0x5f   : > { %2206 = vsyncadd (%p2540_p8), %s240_s7, 4294967168  ;;  %p2541_p10 = scmp.eq.s32.totalorder %s2296_s22, 0 }
  0x61   : > { %2208 = dma.done.wait (%p2541_p10), [#allocation6], 24768   ;;  %p2542_p11 = pmov %p2541_p10 }
  0x62   : > { %p2543_p1 = pmov %p2541_p10 }
  0x63   : > { %2210 = vsyncadd (%p2542_p11), [#allocation6], 4294942528 }
  0x64   : > { %2212 = dma.done.wait (%p2543_p1), [#allocation9], 24576   ;;  %p2544_p2 = pmov %p2543_p1 }
  0x65   : > { %v2243_v0 = vmov 0.0   ;;  %v464_v1 = vld [vmem:[#allocation5 + $0x5a8] sm:$0xff]  ;;  %v466_v2 = vld [vmem:[#allocation5 + $0x5b8] sm:$0xff]  ;;  %v463_v3 = vld [vmem:[#allocation5 + $0x5a0] sm:$0xff]  ;;  %s1756_s15 = sshll.u32 %s2296_s22, 7  ;;  %s281_s17 = scalar_lea.vmem [#allocation10], %s1749_s30 }
  0x66   : > { %2214 = vsyncadd (%p2544_p2), [#allocation9], 4294942720  ;;  %603 = vmatprep.mubr.f32.mxu0 %v2243_v0  ;;  %674 = vmatprep.mubr.f32.mxu1 %v2243_v0  ;;  %v465_v4 = vld [vmem:[#allocation5 + $0x5b0] sm:$0xff]  ;;  %v452_v5 = vld [vmem:[#allocation5 + $0x548] sm:$0xff]  ;;  %s1641_s23 = sshll.u32 %s281_s17, 4  ;;  %s2485_s8 = scalar_lea.hbm %s2527_s5, %s1756_s15  ;;  %s1642_s23 = int_to_ptr.vmem [resolvable:$true] %s1641_s23 }
  0x67   : > { %539 = vmatprep.subr.mxu0 %v464_v1  ;;  %610 = vmatprep.subr.mxu1 %v466_v2  ;;  %v454_v6 = vld [vmem:[#allocation5 + $0x558] sm:$0xff]  ;;  %v451_v7 = vld [vmem:[#allocation5 + $0x540] sm:$0xff]  ;;  %v453_v8 = vld [vmem:[#allocation5 + $0x550] sm:$0xff]  ;;  %s1628_s13 = scalar_lea.sflag [#allocation4], %s2401_s28  ;;  %s2161_s29 = scalar_lea.vmem %s1642_s23, 128 }
  0x68   : > { %540 = vmatpush1.msra.mxu0 %v463_v3  ;;  %611 = vmatpush1.msra.mxu1 %v465_v4  ;;  %v440_v9 = vld [vmem:[#allocation5 + $0x4e8] sm:$0xff]  ;;  %v442_v10 = vld [vmem:[#allocation5 + $0x4f8] sm:$0xff]  ;;  %v439_v11 = vld [vmem:[#allocation5 + $0x4e0] sm:$0xff]  ;;  %p2162_p4 = scmp.ne.s32.totalorder %s1642_s23, %s2161_s29  ;;  %p2545_p6 = scmp.ne.s32.totalorder %s2537_s11, 0 }
  0x69   : > { %541 = vmatprep.subr.mxu0 %v452_v5  ;;  %612 = vmatprep.subr.mxu1 %v454_v6  ;;  %v441_v12 = vld [vmem:[#allocation5 + $0x4f0] sm:$0xff]  ;;  %v428_v13 = vld [vmem:[#allocation5 + $0x488] sm:$0xff]  ;;  %v430_v14 = vld [vmem:[#allocation5 + $0x498] sm:$0xff]  ;;  %s2244_s14 = smov [#allocation10]  }
  0x6a   : > { %542 = vmatpush1.msra.mxu0 %v451_v7  ;;  %613 = vmatpush1.msra.mxu1 %v453_v8  ;;  %v427_v15 = vld [vmem:[#allocation5 + $0x480] sm:$0xff]  ;;  %v429_v16 = vld [vmem:[#allocation5 + $0x490] sm:$0xff]  ;;  %v416_v17 = vld [vmem:[#allocation5 + $0x428] sm:$0xff]  ;;  %p2163_p12 = pnand %p2162_p4, %p2545_p6  ;;  %s2165_s16 = sshll.u32 %s2244_s14, 4  ;;  %s2166_s16 = int_to_ptr.vmem [resolvable:$false] %s2165_s16 }
  0x6b   : > { %543 = vmatprep.subr.mxu0 %v440_v9  ;;  %614 = vmatprep.subr.mxu1 %v442_v10  ;;  %v418_v18 = vld [vmem:[#allocation5 + $0x438] sm:$0xff]  ;;  %v415_v19 = vld [vmem:[#allocation5 + $0x420] sm:$0xff]  ;;  %v417_v20 = vld [vmem:[#allocation5 + $0x430] sm:$0xff]  ;;  %s2167_s22 = scalar_lea.vmem %s2166_s16, 256  ;;  %p2168_p5 = scmp.lt.s32.totalorder %s1642_s23, %s2166_s16 }
  0x6c   : > { %544 = vmatpush1.msra.mxu0 %v439_v11  ;;  %615 = vmatpush1.msra.mxu1 %v441_v12  ;;  %v404_v21 = vld [vmem:[#allocation5 + $0x3c8] sm:$0xff]  ;;  %v406_v22 = vld [vmem:[#allocation5 + $0x3d8] sm:$0xff]  ;;  %v403_v23 = vld [vmem:[#allocation5 + $0x3c0] sm:$0xff]  ;;  %p2164_p0 = pneg %p2163_p12  ;;  %p2169_p3 = scmp.lt.s32.totalorder %s2167_s22, %s2161_s29 }
  0x6d   : > { %545 = vmatprep.subr.mxu0 %v428_v13  ;;  %616 = vmatprep.subr.mxu1 %v430_v14  ;;  %v405_v24 = vld [vmem:[#allocation5 + $0x3d0] sm:$0xff]  ;;  %v392_v25 = vld [vmem:[#allocation5 + $0x368] sm:$0xff]  ;;  %v394_v26 = vld [vmem:[#allocation5 + $0x378] sm:$0xff] }
  0x6e   : > { %546 = vmatpush1.msra.mxu0 %v427_v15  ;;  %617 = vmatpush1.msra.mxu1 %v429_v16  ;;  %v391_v27 = vld [vmem:[#allocation5 + $0x360] sm:$0xff]  ;;  %v393_v28 = vld [vmem:[#allocation5 + $0x370] sm:$0xff]  ;;  %v380_v29 = vld [vmem:[#allocation5 + $0x308] sm:$0xff]  ;;  %p2170_p7 = por %p2169_p3, %p2168_p5 }
  0x6f   : > { %547 = vmatprep.subr.mxu0 %v416_v17  ;;  %618 = vmatprep.subr.mxu1 %v418_v18  ;;  %v382_v30 = vld [vmem:[#allocation5 + $0x318] sm:$0xff]  ;;  %v379_v31 = vld [vmem:[#allocation5 + $0x300] sm:$0xff]  ;;  %v381_v32 = vld [vmem:[#allocation5 + $0x310] sm:$0xff] }
  0x70   : > { %548 = vmatpush1.msra.mxu0 %v415_v19  ;;  %619 = vmatpush1.msra.mxu1 %v417_v20  ;;  %v368_v33 = vld [vmem:[#allocation5 + $0x2a8] sm:$0xff]  ;;  %v370_v34 = vld [vmem:[#allocation5 + $0x2b8] sm:$0xff]  ;;  %v367_v35 = vld [vmem:[#allocation5 + $0x2a0] sm:$0xff]  ;;  %p2171_p9 = pnand %p2170_p7, %p2164_p0 }
  0x71   : > { %549 = vmatprep.subr.mxu0 %v404_v21  ;;  %620 = vmatprep.subr.mxu1 %v406_v22  ;;  %v369_v36 = vld [vmem:[#allocation5 + $0x2b0] sm:$0xff]  ;;  %v356_v37 = vld [vmem:[#allocation5 + $0x248] sm:$0xff]  ;;  %v358_v38 = vld [vmem:[#allocation5 + $0x258] sm:$0xff] }
  0x72   : > { %550 = vmatpush1.msra.mxu0 %v403_v23  ;;  %621 = vmatpush1.msra.mxu1 %v405_v24  ;;  %v355_v39 = vld [vmem:[#allocation5 + $0x240] sm:$0xff]  ;;  %v357_v40 = vld [vmem:[#allocation5 + $0x250] sm:$0xff]  ;;  %v344_v41 = vld [vmem:[#allocation5 + $0x1e8] sm:$0xff] }
  0x73   : > { %551 = vmatprep.subr.mxu0 %v392_v25  ;;  %622 = vmatprep.subr.mxu1 %v394_v26  ;;  %v346_v42 = vld [vmem:[#allocation5 + $0x1f8] sm:$0xff]  ;;  %v343_v43 = vld [vmem:[#allocation5 + $0x1e0] sm:$0xff]  ;;  %v345_v44 = vld [vmem:[#allocation5 + $0x1f0] sm:$0xff] }
  0x74   : > { %552 = vmatpush1.msra.mxu0 %v391_v27  ;;  %623 = vmatpush1.msra.mxu1 %v393_v28  ;;  %v332_v45 = vld [vmem:[#allocation5 + $0x188] sm:$0xff]  ;;  %v334_v46 = vld [vmem:[#allocation5 + $0x198] sm:$0xff]  ;;  %v331_v47 = vld [vmem:[#allocation5 + $0x180] sm:$0xff] }
  0x75   : > { %553 = vmatprep.subr.mxu0 %v380_v29  ;;  %624 = vmatprep.subr.mxu1 %v382_v30  ;;  %v333_v48 = vld [vmem:[#allocation5 + $0x190] sm:$0xff]  ;;  %v320_v49 = vld [vmem:[#allocation5 + $0x128] sm:$0xff]  ;;  %v322_v50 = vld [vmem:[#allocation5 + $0x138] sm:$0xff] }
  0x76   : > { %554 = vmatpush1.msra.mxu0 %v379_v31  ;;  %625 = vmatpush1.msra.mxu1 %v381_v32  ;;  %v319_v51 = vld [vmem:[#allocation5 + $0x120] sm:$0xff]  ;;  %v321_v52 = vld [vmem:[#allocation5 + $0x130] sm:$0xff]  ;;  %v308_v53 = vld [vmem:[#allocation5 + $0xc8] sm:$0xff] }
  0x77   : > { %555 = vmatprep.subr.mxu0 %v368_v33  ;;  %626 = vmatprep.subr.mxu1 %v370_v34  ;;  %v310_v54 = vld [vmem:[#allocation5 + $0xd8] sm:$0xff]  ;;  %v307_v55 = vld [vmem:[#allocation5 + $0xc0] sm:$0xff]  ;;  %v309_v56 = vld [vmem:[#allocation5 + $0xd0] sm:$0xff] }
  0x78   : > { %556 = vmatpush1.msra.mxu0 %v367_v35  ;;  %627 = vmatpush1.msra.mxu1 %v369_v36  ;;  %v296_v57 = vld [vmem:[#allocation5 + $0x68] sm:$0xff]  ;;  %v298_v58 = vld [vmem:[#allocation5 + $0x78] sm:$0xff]  ;;  %v295_v59 = vld [vmem:[#allocation5 + $0x60] sm:$0xff] }
  0x79   : > { %557 = vmatprep.subr.mxu0 %v356_v37  ;;  %628 = vmatprep.subr.mxu1 %v358_v38  ;;  %v297_v60 = vld [vmem:[#allocation5 + $0x70] sm:$0xff]  ;;  %v284_v61 = vld [vmem:[#allocation5 + $0x8] sm:$0xff]  ;;  %v286_v62 = vld [vmem:[#allocation5 + $0x18] sm:$0xff] }
  0x7a   : > { %558 = vmatpush1.msra.mxu0 %v355_v39  ;;  %629 = vmatpush1.msra.mxu1 %v357_v40  ;;  %v283_v63 = vld [vmem:[#allocation5] sm:$0xff]  ;;  %v285_v1 = vld [vmem:[#allocation5 + $0x10] sm:$0xff]  ;;  %v468_v3 = vld [vmem:[#allocation5 + $0x5c8] sm:$0xff] }
  0x7b   : > { %559 = vmatprep.subr.mxu0 %v344_v41  ;;  %630 = vmatprep.subr.mxu1 %v346_v42  ;;  %v2424_v2 = vld [vmem:[%s2407_s9] sm:$0xff]  ;;  %v467_v5 = vld [vmem:[#allocation5 + $0x5c0] sm:$0xff]  ;;  %v456_v7 = vld [vmem:[#allocation5 + $0x568] sm:$0xff] }
  0x7c   : > { %560 = vmatpush1.msra.mxu0 %v343_v43  ;;  %631 = vmatpush1.msra.mxu1 %v345_v44  ;;  %v470_v4 = vld [vmem:[#allocation5 + $0x5d8] sm:$0xff]  ;;  %v469_v6 = vld [vmem:[#allocation5 + $0x5d0] sm:$0xff]  ;;  %v455_v9 = vld [vmem:[#allocation5 + $0x560] sm:$0xff] }
  0x7d   : > { %561 = vmatprep.subr.mxu0 %v332_v45  ;;  %632 = vmatprep.subr.mxu1 %v334_v46  ;;  %v458_v8 = vld [vmem:[#allocation5 + $0x578] sm:$0xff]  ;;  %v457_v10 = vld [vmem:[#allocation5 + $0x570] sm:$0xff]  ;;  %v444_v11 = vld [vmem:[#allocation5 + $0x508] sm:$0xff] }
  0x7e   : > { %562 = vmatpush1.msra.mxu0 %v331_v47  ;;  %633 = vmatpush1.msra.mxu1 %v333_v48  ;;  %v446_v12 = vld [vmem:[#allocation5 + $0x518] sm:$0xff]  ;;  %v443_v13 = vld [vmem:[#allocation5 + $0x500] sm:$0xff]  ;;  %v445_v14 = vld [vmem:[#allocation5 + $0x510] sm:$0xff] }
  0x7f   : > { %563 = vmatprep.subr.mxu0 %v320_v49  ;;  %634 = vmatprep.subr.mxu1 %v322_v50  ;;  %v432_v15 = vld [vmem:[#allocation5 + $0x4a8] sm:$0xff]  ;;  %v434_v16 = vld [vmem:[#allocation5 + $0x4b8] sm:$0xff]  ;;  %v431_v17 = vld [vmem:[#allocation5 + $0x4a0] sm:$0xff] }
  0x80   : > { %564 = vmatpush1.msra.mxu0 %v319_v51  ;;  %635 = vmatpush1.msra.mxu1 %v321_v52  ;;  %v433_v18 = vld [vmem:[#allocation5 + $0x4b0] sm:$0xff]  ;;  %v420_v19 = vld [vmem:[#allocation5 + $0x448] sm:$0xff]  ;;  %v422_v20 = vld [vmem:[#allocation5 + $0x458] sm:$0xff] }
  0x81   : > { %565 = vmatprep.subr.mxu0 %v308_v53  ;;  %636 = vmatprep.subr.mxu1 %v310_v54  ;;  %v419_v21 = vld [vmem:[#allocation5 + $0x440] sm:$0xff]  ;;  %v421_v22 = vld [vmem:[#allocation5 + $0x450] sm:$0xff]  ;;  %v408_v23 = vld [vmem:[#allocation5 + $0x3e8] sm:$0xff] }
  0x82   : > { %566 = vmatpush1.msra.mxu0 %v307_v55  ;;  %637 = vmatpush1.msra.mxu1 %v309_v56  ;;  %v410_v24 = vld [vmem:[#allocation5 + $0x3f8] sm:$0xff]  ;;  %v407_v25 = vld [vmem:[#allocation5 + $0x3e0] sm:$0xff]  ;;  %v409_v26 = vld [vmem:[#allocation5 + $0x3f0] sm:$0xff] }
  0x83   : > { %567 = vmatprep.subr.mxu0 %v296_v57  ;;  %638 = vmatprep.subr.mxu1 %v298_v58  ;;  %v396_v27 = vld [vmem:[#allocation5 + $0x388] sm:$0xff]  ;;  %v398_v28 = vld [vmem:[#allocation5 + $0x398] sm:$0xff]  ;;  %v395_v29 = vld [vmem:[#allocation5 + $0x380] sm:$0xff] }
  0x84   : > { %568 = vmatpush1.msra.mxu0 %v295_v59  ;;  %639 = vmatpush1.msra.mxu1 %v297_v60  ;;  %v397_v30 = vld [vmem:[#allocation5 + $0x390] sm:$0xff]  ;;  %v384_v31 = vld [vmem:[#allocation5 + $0x328] sm:$0xff]  ;;  %v386_v32 = vld [vmem:[#allocation5 + $0x338] sm:$0xff] }
  0x85   : > { %569 = vmatprep.subr.mxu0 %v284_v61  ;;  %640 = vmatprep.subr.mxu1 %v286_v62  ;;  %v383_v33 = vld [vmem:[#allocation5 + $0x320] sm:$0xff]  ;;  %v385_v34 = vld [vmem:[#allocation5 + $0x330] sm:$0xff]  ;;  %v372_v35 = vld [vmem:[#allocation5 + $0x2c8] sm:$0xff] }
  0x86   : > { %570 = vmatpush1.msra.mxu0 %v283_v63  ;;  %641 = vmatpush1.msra.mxu1 %v285_v1  ;;  %v374_v36 = vld [vmem:[#allocation5 + $0x2d8] sm:$0xff]  ;;  %v371_v37 = vld [vmem:[#allocation5 + $0x2c0] sm:$0xff]  ;;  %v373_v38 = vld [vmem:[#allocation5 + $0x2d0] sm:$0xff] }
  0x87   : > { %604 = vmatmul.mubr.f32.vlgmr.msra.gmra.mxu0 %v2424_v2  ;;  %675 = vmatmul.mubr.f32.vlgmr.msra.gmra.mxu1 %v2424_v2  ;;  %v360_v39 = vld [vmem:[#allocation5 + $0x268] sm:$0xff]  ;;  %v362_v40 = vld [vmem:[#allocation5 + $0x278] sm:$0xff]  ;;  %v359_v41 = vld [vmem:[#allocation5 + $0x260] sm:$0xff] }
  0x88   : > { %681 = vmatprep.subr.mxu0 %v468_v3  ;;  %752 = vmatprep.subr.mxu1 %v470_v4  ;;  %v361_v42 = vld [vmem:[#allocation5 + $0x270] sm:$0xff]  ;;  %v348_v43 = vld [vmem:[#allocation5 + $0x208] sm:$0xff]  ;;  %v350_v44 = vld [vmem:[#allocation5 + $0x218] sm:$0xff] }
  0x89   : > { %682 = vmatpush1.msra.mxu0 %v467_v5  ;;  %753 = vmatpush1.msra.mxu1 %v469_v6  ;;  %v347_v45 = vld [vmem:[#allocation5 + $0x200] sm:$0xff]  ;;  %v349_v46 = vld [vmem:[#allocation5 + $0x210] sm:$0xff]  ;;  %v336_v47 = vld [vmem:[#allocation5 + $0x1a8] sm:$0xff] }
  0x8a   : > { %683 = vmatprep.subr.mxu0 %v456_v7  ;;  %754 = vmatprep.subr.mxu1 %v458_v8  ;;  %v338_v48 = vld [vmem:[#allocation5 + $0x1b8] sm:$0xff]  ;;  %v335_v49 = vld [vmem:[#allocation5 + $0x1a0] sm:$0xff]  ;;  %v337_v50 = vld [vmem:[#allocation5 + $0x1b0] sm:$0xff] }
  0x8b   : > { %684 = vmatpush1.msra.mxu0 %v455_v9  ;;  %755 = vmatpush1.msra.mxu1 %v457_v10  ;;  %v324_v51 = vld [vmem:[#allocation5 + $0x148] sm:$0xff]  ;;  %v326_v52 = vld [vmem:[#allocation5 + $0x158] sm:$0xff]  ;;  %v323_v53 = vld [vmem:[#allocation5 + $0x140] sm:$0xff] }
  0x8c   : > { %685 = vmatprep.subr.mxu0 %v444_v11  ;;  %756 = vmatprep.subr.mxu1 %v446_v12  ;;  %v325_v54 = vld [vmem:[#allocation5 + $0x150] sm:$0xff]  ;;  %v312_v55 = vld [vmem:[#allocation5 + $0xe8] sm:$0xff]  ;;  %v314_v56 = vld [vmem:[#allocation5 + $0xf8] sm:$0xff] }
  0x8d   : > { %686 = vmatpush1.msra.mxu0 %v443_v13  ;;  %757 = vmatpush1.msra.mxu1 %v445_v14  ;;  %v311_v57 = vld [vmem:[#allocation5 + $0xe0] sm:$0xff]  ;;  %v313_v58 = vld [vmem:[#allocation5 + $0xf0] sm:$0xff]  ;;  %v300_v59 = vld [vmem:[#allocation5 + $0x88] sm:$0xff] }
  0x8e   : > { %687 = vmatprep.subr.mxu0 %v432_v15  ;;  %758 = vmatprep.subr.mxu1 %v434_v16  ;;  %v302_v60 = vld [vmem:[#allocation5 + $0x98] sm:$0xff]  ;;  %v299_v61 = vld [vmem:[#allocation5 + $0x80] sm:$0xff]  ;;  %v301_v62 = vld [vmem:[#allocation5 + $0x90] sm:$0xff] }
  0x8f   : > { %688 = vmatpush1.msra.mxu0 %v431_v17  ;;  %759 = vmatpush1.msra.mxu1 %v433_v18  ;;  %v288_v63 = vld [vmem:[#allocation5 + $0x28] sm:$0xff]  ;;  %v290_v1 = vld [vmem:[#allocation5 + $0x38] sm:$0xff]  ;;  %v287_v3 = vld [vmem:[#allocation5 + $0x20] sm:$0xff] }
  0x90   : > { %689 = vmatprep.subr.mxu0 %v420_v19  ;;  %760 = vmatprep.subr.mxu1 %v422_v20  ;;  %v289_v4 = vld [vmem:[#allocation5 + $0x30] sm:$0xff]  ;;  %v472_v5 = vld [vmem:[#allocation5 + $0x5e8] sm:$0xff]  ;;  %v474_v6 = vld [vmem:[#allocation5 + $0x5f8] sm:$0xff] }
  0x91   : > { %690 = vmatpush1.msra.mxu0 %v419_v21  ;;  %761 = vmatpush1.msra.mxu1 %v421_v22  ;;  %v471_v7 = vld [vmem:[#allocation5 + $0x5e0] sm:$0xff]  ;;  %v473_v8 = vld [vmem:[#allocation5 + $0x5f0] sm:$0xff]  ;;  %v460_v9 = vld [vmem:[#allocation5 + $0x588] sm:$0xff] }
  0x92   : > { %691 = vmatprep.subr.mxu0 %v408_v23  ;;  %762 = vmatprep.subr.mxu1 %v410_v24  ;;  %v462_v10 = vld [vmem:[#allocation5 + $0x598] sm:$0xff]  ;;  %v459_v11 = vld [vmem:[#allocation5 + $0x580] sm:$0xff]  ;;  %v461_v12 = vld [vmem:[#allocation5 + $0x590] sm:$0xff] }
  0x93   : > { %692 = vmatpush1.msra.mxu0 %v407_v25  ;;  %763 = vmatpush1.msra.mxu1 %v409_v26  ;;  %v448_v13 = vld [vmem:[#allocation5 + $0x528] sm:$0xff]  ;;  %v450_v14 = vld [vmem:[#allocation5 + $0x538] sm:$0xff]  ;;  %v447_v15 = vld [vmem:[#allocation5 + $0x520] sm:$0xff] }
  0x94   : > { %693 = vmatprep.subr.mxu0 %v396_v27  ;;  %764 = vmatprep.subr.mxu1 %v398_v28  ;;  %v449_v16 = vld [vmem:[#allocation5 + $0x530] sm:$0xff]  ;;  %v436_v17 = vld [vmem:[#allocation5 + $0x4c8] sm:$0xff]  ;;  %v438_v18 = vld [vmem:[#allocation5 + $0x4d8] sm:$0xff] }
  0x95   : > { %694 = vmatpush1.msra.mxu0 %v395_v29  ;;  %765 = vmatpush1.msra.mxu1 %v397_v30  ;;  %v435_v19 = vld [vmem:[#allocation5 + $0x4c0] sm:$0xff]  ;;  %v437_v20 = vld [vmem:[#allocation5 + $0x4d0] sm:$0xff]  ;;  %v424_v21 = vld [vmem:[#allocation5 + $0x468] sm:$0xff] }
  0x96   : > { %695 = vmatprep.subr.mxu0 %v384_v31  ;;  %766 = vmatprep.subr.mxu1 %v386_v32  ;;  %v426_v22 = vld [vmem:[#allocation5 + $0x478] sm:$0xff]  ;;  %v423_v23 = vld [vmem:[#allocation5 + $0x460] sm:$0xff]  ;;  %v425_v24 = vld [vmem:[#allocation5 + $0x470] sm:$0xff] }
  0x97   : > { %696 = vmatpush1.msra.mxu0 %v383_v33  ;;  %767 = vmatpush1.msra.mxu1 %v385_v34  ;;  %v412_v25 = vld [vmem:[#allocation5 + $0x408] sm:$0xff]  ;;  %v414_v26 = vld [vmem:[#allocation5 + $0x418] sm:$0xff]  ;;  %v411_v27 = vld [vmem:[#allocation5 + $0x400] sm:$0xff] }
  0x98   : > { %697 = vmatprep.subr.mxu0 %v372_v35  ;;  %768 = vmatprep.subr.mxu1 %v374_v36  ;;  %v413_v28 = vld [vmem:[#allocation5 + $0x410] sm:$0xff]  ;;  %v400_v29 = vld [vmem:[#allocation5 + $0x3a8] sm:$0xff]  ;;  %v402_v30 = vld [vmem:[#allocation5 + $0x3b8] sm:$0xff] }
  0x99   : > { %698 = vmatpush1.msra.mxu0 %v371_v37  ;;  %769 = vmatpush1.msra.mxu1 %v373_v38  ;;  %v399_v31 = vld [vmem:[#allocation5 + $0x3a0] sm:$0xff]  ;;  %v401_v32 = vld [vmem:[#allocation5 + $0x3b0] sm:$0xff]  ;;  %v388_v33 = vld [vmem:[#allocation5 + $0x348] sm:$0xff] }
  0x9a   : > { %699 = vmatprep.subr.mxu0 %v360_v39  ;;  %770 = vmatprep.subr.mxu1 %v362_v40  ;;  %v390_v34 = vld [vmem:[#allocation5 + $0x358] sm:$0xff]  ;;  %v387_v35 = vld [vmem:[#allocation5 + $0x340] sm:$0xff]  ;;  %v389_v36 = vld [vmem:[#allocation5 + $0x350] sm:$0xff] }
  0x9b   : > { %700 = vmatpush1.msra.mxu0 %v359_v41  ;;  %771 = vmatpush1.msra.mxu1 %v361_v42  ;;  %v376_v37 = vld [vmem:[#allocation5 + $0x2e8] sm:$0xff]  ;;  %v378_v38 = vld [vmem:[#allocation5 + $0x2f8] sm:$0xff]  ;;  %v375_v39 = vld [vmem:[#allocation5 + $0x2e0] sm:$0xff] }
  0x9c   : > { %701 = vmatprep.subr.mxu0 %v348_v43  ;;  %772 = vmatprep.subr.mxu1 %v350_v44  ;;  %v377_v40 = vld [vmem:[#allocation5 + $0x2f0] sm:$0xff]  ;;  %v364_v41 = vld [vmem:[#allocation5 + $0x288] sm:$0xff]  ;;  %v366_v42 = vld [vmem:[#allocation5 + $0x298] sm:$0xff] }
  0x9d   : > { %702 = vmatpush1.msra.mxu0 %v347_v45  ;;  %773 = vmatpush1.msra.mxu1 %v349_v46  ;;  %v363_v43 = vld [vmem:[#allocation5 + $0x280] sm:$0xff]  ;;  %v365_v44 = vld [vmem:[#allocation5 + $0x290] sm:$0xff]  ;;  %v352_v45 = vld [vmem:[#allocation5 + $0x228] sm:$0xff] }
  0x9e   : > { %703 = vmatprep.subr.mxu0 %v336_v47  ;;  %774 = vmatprep.subr.mxu1 %v338_v48  ;;  %v354_v46 = vld [vmem:[#allocation5 + $0x238] sm:$0xff]  ;;  %v351_v47 = vld [vmem:[#allocation5 + $0x220] sm:$0xff]  ;;  %v353_v48 = vld [vmem:[#allocation5 + $0x230] sm:$0xff] }
  0x9f   : > { %704 = vmatpush1.msra.mxu0 %v335_v49  ;;  %775 = vmatpush1.msra.mxu1 %v337_v50  ;;  %v340_v49 = vld [vmem:[#allocation5 + $0x1c8] sm:$0xff]  ;;  %v342_v50 = vld [vmem:[#allocation5 + $0x1d8] sm:$0xff] }
  0xa0   : > { %705 = vmatprep.subr.mxu0 %v324_v51  ;;  %776 = vmatprep.subr.mxu1 %v326_v52  ;;  %v339_v51 = vld [vmem:[#allocation5 + $0x1c0] sm:$0xff]  ;;  %v341_v52 = vld [vmem:[#allocation5 + $0x1d0] sm:$0xff] }
  0xa1   : > { %706 = vmatpush1.msra.mxu0 %v323_v53  ;;  %777 = vmatpush1.msra.mxu1 %v325_v54  ;;  %v328_v53 = vld [vmem:[#allocation5 + $0x168] sm:$0xff]  ;;  %v330_v54 = vld [vmem:[#allocation5 + $0x178] sm:$0xff] }
  0xa2   : > { %707 = vmatprep.subr.mxu0 %v312_v55  ;;  %778 = vmatprep.subr.mxu1 %v314_v56  ;;  %v327_v55 = vld [vmem:[#allocation5 + $0x160] sm:$0xff]  ;;  %v329_v56 = vld [vmem:[#allocation5 + $0x170] sm:$0xff] }
  0xa3   : > { %708 = vmatpush1.msra.mxu0 %v311_v57  ;;  %779 = vmatpush1.msra.mxu1 %v313_v58  ;;  %v316_v57 = vld [vmem:[#allocation5 + $0x108] sm:$0xff]  ;;  %v318_v58 = vld [vmem:[#allocation5 + $0x118] sm:$0xff] }
  0xa4   : > { %709 = vmatprep.subr.mxu0 %v300_v59  ;;  %780 = vmatprep.subr.mxu1 %v302_v60  ;;  %v315_v59 = vld [vmem:[#allocation5 + $0x100] sm:$0xff]  ;;  %v317_v60 = vld [vmem:[#allocation5 + $0x110] sm:$0xff] }
  0xa5   : > { %710 = vmatpush1.msra.mxu0 %v299_v61  ;;  %781 = vmatpush1.msra.mxu1 %v301_v62  ;;  %v304_v61 = vld [vmem:[#allocation5 + $0xa8] sm:$0xff]  ;;  %v306_v62 = vld [vmem:[#allocation5 + $0xb8] sm:$0xff] }
  0xa6   : > { %711 = vmatprep.subr.mxu0 %v288_v63  ;;  %782 = vmatprep.subr.mxu1 %v290_v1  ;;  %v303_v63 = vld [vmem:[#allocation5 + $0xa0] sm:$0xff]  ;;  %v305_v1 = vld [vmem:[#allocation5 + $0xb0] sm:$0xff] }
  0xa7   : > { %712 = vmatpush1.msra.mxu0 %v287_v3  ;;  %745 = vmatprep.mubr.f32.mxu0 %v2243_v0  ;;  %v292_v3 = vld [vmem:[#allocation5 + $0x48] sm:$0xff] }
  0xa8   : > { %783 = vmatpush1.msra.mxu1 %v289_v4  ;;  %816 = vmatprep.mubr.f32.mxu1 %v2243_v0  ;;  %v294_v4 = vld [vmem:[#allocation5 + $0x58] sm:$0xff] }
  0xa9   : > { %746 = vmatmul.mubr.f32.vlgmr.msra.gmra.mxu0 %v2424_v2  ;;  %817 = vmatmul.mubr.f32.vlgmr.msra.gmra.mxu1 %v2424_v2 }
  0xaa   : > { %823 = vmatprep.subr.mxu0 %v472_v5  ;;  %894 = vmatprep.subr.mxu1 %v474_v6  ;;  %v291_v5 = vld [vmem:[#allocation5 + $0x40] sm:$0xff]  ;;  %v293_v6 = vld [vmem:[#allocation5 + $0x50] sm:$0xff] }
  0xab   : > { %824 = vmatpush1.msra.mxu0 %v471_v7  ;;  %895 = vmatpush1.msra.mxu1 %v473_v8  ;;  %v1032_v7 = vld [vmem:[#allocation8 + $0xf8] sm:$0xff] }
  0xac   : > { %825 = vmatprep.subr.mxu0 %v460_v9  ;;  %896 = vmatprep.subr.mxu1 %v462_v10  ;;  %v1064_v8 = vld [vmem:[#allocation8 + $0x1f8] sm:$0xff] }
  0xad   : > { %826 = vmatpush1.msra.mxu0 %v459_v11  ;;  %897 = vmatpush1.msra.mxu1 %v461_v12  ;;  %v1016_v9 = vld [vmem:[#allocation8 + $0x78] sm:$0xff]  ;;  %v1031_v11 = vld [vmem:[#allocation8 + $0xf0] sm:$0xff] }
  0xae   : > { %827 = vmatprep.subr.mxu0 %v448_v13  ;;  %898 = vmatprep.subr.mxu1 %v450_v14  ;;  %v1048_v10 = vld [vmem:[#allocation8 + $0x178] sm:$0xff]  ;;  %v1063_v12 = vld [vmem:[#allocation8 + $0x1f0] sm:$0xff] }
  0xaf   : > { %828 = vmatpush1.msra.mxu0 %v447_v15  ;;  %899 = vmatpush1.msra.mxu1 %v449_v16  ;;  %v1015_v13 = vld [vmem:[#allocation8 + $0x70] sm:$0xff]  ;;  %v1030_v15 = vld [vmem:[#allocation8 + $0xe8] sm:$0xff] }
  0xb0   : > { %829 = vmatprep.subr.mxu0 %v436_v17  ;;  %900 = vmatprep.subr.mxu1 %v438_v18  ;;  %v1047_v14 = vld [vmem:[#allocation8 + $0x170] sm:$0xff]  ;;  %v1062_v16 = vld [vmem:[#allocation8 + $0x1e8] sm:$0xff]  ;;  %v1029_v18 = vld [vmem:[#allocation8 + $0xe0] sm:$0xff] }
  0xb1   : > { %830 = vmatpush1.msra.mxu0 %v435_v19  ;;  %901 = vmatpush1.msra.mxu1 %v437_v20  ;;  %v1014_v17 = vld [vmem:[#allocation8 + $0x68] sm:$0xff]  ;;  %v1061_v19 = vld [vmem:[#allocation8 + $0x1e0] sm:$0xff] }
  0xb2   : > { %831 = vmatprep.subr.mxu0 %v424_v21  ;;  %902 = vmatprep.subr.mxu1 %v426_v22  ;;  %v1045_v20 = vld [vmem:[#allocation8 + $0x160] sm:$0xff]  ;;  %v1028_v21 = vld [vmem:[#allocation8 + $0xd8] sm:$0xff] }
  0xb3   : > { %832 = vmatpush1.msra.mxu0 %v423_v23  ;;  %903 = vmatpush1.msra.mxu1 %v425_v24  ;;  %v1060_v22 = vld [vmem:[#allocation8 + $0x1d8] sm:$0xff] }
  0xb4   : > { %833 = vmatprep.subr.mxu0 %v412_v25  ;;  %904 = vmatprep.subr.mxu1 %v414_v26  ;;  %v1012_v23 = vld [vmem:[#allocation8 + $0x58] sm:$0xff]  ;;  %v1027_v25 = vld [vmem:[#allocation8 + $0xd0] sm:$0xff] }
  0xb5   : > { %834 = vmatpush1.msra.mxu0 %v411_v27  ;;  %905 = vmatpush1.msra.mxu1 %v413_v28  ;;  %v1044_v24 = vld [vmem:[#allocation8 + $0x158] sm:$0xff]  ;;  %v1059_v26 = vld [vmem:[#allocation8 + $0x1d0] sm:$0xff] }
  0xb6   : > { %835 = vmatprep.subr.mxu0 %v400_v29  ;;  %906 = vmatprep.subr.mxu1 %v402_v30  ;;  %v1011_v27 = vld [vmem:[#allocation8 + $0x50] sm:$0xff]  ;;  %v1026_v29 = vld [vmem:[#allocation8 + $0xc8] sm:$0xff] }
  0xb7   : > { %836 = vmatpush1.msra.mxu0 %v399_v31  ;;  %907 = vmatpush1.msra.mxu1 %v401_v32  ;;  %v1043_v28 = vld [vmem:[#allocation8 + $0x150] sm:$0xff]  ;;  %v1058_v30 = vld [vmem:[#allocation8 + $0x1c8] sm:$0xff] }
  0xb8   : > { %837 = vmatprep.subr.mxu0 %v388_v33  ;;  %908 = vmatprep.subr.mxu1 %v390_v34  ;;  %v1010_v31 = vld [vmem:[#allocation8 + $0x48] sm:$0xff]  ;;  %v1025_v33 = vld [vmem:[#allocation8 + $0xc0] sm:$0xff] }
  0xb9   : > { %838 = vmatpush1.msra.mxu0 %v387_v35  ;;  %909 = vmatpush1.msra.mxu1 %v389_v36  ;;  %v1042_v32 = vld [vmem:[#allocation8 + $0x148] sm:$0xff]  ;;  %v1057_v34 = vld [vmem:[#allocation8 + $0x1c0] sm:$0xff] }
  0xba   : > { %839 = vmatprep.subr.mxu0 %v376_v37  ;;  %910 = vmatprep.subr.mxu1 %v378_v38  ;;  %v1009_v35 = vld [vmem:[#allocation8 + $0x40] sm:$0xff]  ;;  %v1024_v37 = vld [vmem:[#allocation8 + $0xb8] sm:$0xff] }
  0xbb   : > { %840 = vmatpush1.msra.mxu0 %v375_v39  ;;  %911 = vmatpush1.msra.mxu1 %v377_v40  ;;  %v1041_v36 = vld [vmem:[#allocation8 + $0x140] sm:$0xff]  ;;  %v1056_v38 = vld [vmem:[#allocation8 + $0x1b8] sm:$0xff] }
  0xbc   : > { %841 = vmatprep.subr.mxu0 %v364_v41  ;;  %912 = vmatprep.subr.mxu1 %v366_v42  ;;  %v1008_v39 = vld [vmem:[#allocation8 + $0x38] sm:$0xff]  ;;  %v1023_v41 = vld [vmem:[#allocation8 + $0xb0] sm:$0xff] }
  0xbd   : > { %842 = vmatpush1.msra.mxu0 %v363_v43  ;;  %913 = vmatpush1.msra.mxu1 %v365_v44  ;;  %v1040_v40 = vld [vmem:[#allocation8 + $0x138] sm:$0xff]  ;;  %v1055_v42 = vld [vmem:[#allocation8 + $0x1b0] sm:$0xff] }
  0xbe   : > { %843 = vmatprep.subr.mxu0 %v352_v45  ;;  %914 = vmatprep.subr.mxu1 %v354_v46  ;;  %v1007_v43 = vld [vmem:[#allocation8 + $0x30] sm:$0xff]  ;;  %v1022_v45 = vld [vmem:[#allocation8 + $0xa8] sm:$0xff] }
  0xbf   : > { %844 = vmatpush1.msra.mxu0 %v351_v47  ;;  %915 = vmatpush1.msra.mxu1 %v353_v48  ;;  %v1039_v44 = vld [vmem:[#allocation8 + $0x130] sm:$0xff]  ;;  %v1054_v46 = vld [vmem:[#allocation8 + $0x1a8] sm:$0xff] }
  0xc0   : > { %845 = vmatprep.subr.mxu0 %v340_v49  ;;  %916 = vmatprep.subr.mxu1 %v342_v50  ;;  %v1006_v47 = vld [vmem:[#allocation8 + $0x28] sm:$0xff]  ;;  %v1021_v49 = vld [vmem:[#allocation8 + $0xa0] sm:$0xff] }
  0xc1   : > { %846 = vmatpush1.msra.mxu0 %v339_v51  ;;  %917 = vmatpush1.msra.mxu1 %v341_v52  ;;  %v1038_v48 = vld [vmem:[#allocation8 + $0x128] sm:$0xff]  ;;  %v1053_v50 = vld [vmem:[#allocation8 + $0x1a0] sm:$0xff] }
  0xc2   : > { %847 = vmatprep.subr.mxu0 %v328_v53  ;;  %918 = vmatprep.subr.mxu1 %v330_v54  ;;  %v1005_v51 = vld [vmem:[#allocation8 + $0x20] sm:$0xff]  ;;  %v1020_v53 = vld [vmem:[#allocation8 + $0x98] sm:$0xff] }
  0xc3   : > { %848 = vmatpush1.msra.mxu0 %v327_v55  ;;  %919 = vmatpush1.msra.mxu1 %v329_v56  ;;  %v1037_v52 = vld [vmem:[#allocation8 + $0x120] sm:$0xff]  ;;  %v1052_v54 = vld [vmem:[#allocation8 + $0x198] sm:$0xff] }
  0xc4   : > { %849 = vmatprep.subr.mxu0 %v316_v57  ;;  %920 = vmatprep.subr.mxu1 %v318_v58  ;;  %v1004_v55 = vld [vmem:[#allocation8 + $0x18] sm:$0xff]  ;;  %v1019_v57 = vld [vmem:[#allocation8 + $0x90] sm:$0xff] }
  0xc5   : > { %850 = vmatpush1.msra.mxu0 %v315_v59  ;;  %921 = vmatpush1.msra.mxu1 %v317_v60  ;;  %v1036_v56 = vld [vmem:[#allocation8 + $0x118] sm:$0xff]  ;;  %v1051_v58 = vld [vmem:[#allocation8 + $0x190] sm:$0xff] }
  0xc6   : > { %851 = vmatprep.subr.mxu0 %v304_v61  ;;  %922 = vmatprep.subr.mxu1 %v306_v62  ;;  %v1003_v59 = vld [vmem:[#allocation8 + $0x10] sm:$0xff]  ;;  %v1018_v61 = vld [vmem:[#allocation8 + $0x88] sm:$0xff] }
  0xc7   : > { %852 = vmatpush1.msra.mxu0 %v303_v63  ;;  %923 = vmatpush1.msra.mxu1 %v305_v1  ;;  %v1035_v60 = vld [vmem:[#allocation8 + $0x110] sm:$0xff]  ;;  %v1050_v62 = vld [vmem:[#allocation8 + $0x188] sm:$0xff] }
  0xc8   : > { %853 = vmatprep.subr.mxu0 %v292_v3  ;;  %924 = vmatprep.subr.mxu1 %v294_v4  ;;  %v1002_v63 = vld [vmem:[#allocation8 + $0x8] sm:$0xff]  ;;  %v1017_v3 = vld [vmem:[#allocation8 + $0x80] sm:$0xff] }
  0xc9   : > { %854 = vmatpush1.msra.mxu0 %v291_v5  ;;  %887 = vmatprep.mubr.f32.mxu0 %v2243_v0  ;;  %v1034_v1 = vld [vmem:[#allocation8 + $0x108] sm:$0xff]  ;;  %v1049_v4 = vld [vmem:[#allocation8 + $0x180] sm:$0xff] }
  0xca   : > { %925 = vmatpush1.msra.mxu1 %v293_v6  ;;  %958 = vmatprep.mubr.f32.mxu1 %v2243_v0  ;;  %v1046_v0 = vld [vmem:[#allocation8 + $0x168] sm:$0xff]  ;;  %v1001_v5 = vld [vmem:[#allocation8] sm:$0xff] }
  0xcb   : > { %888 = vmatmul.mubr.f32.vlgmr.msra.gmra.mxu0 %v2424_v2  ;;  %959 = vmatmul.mubr.f32.vlgmr.msra.gmra.mxu1 %v2424_v2  ;;  %v1013_v2 = vld [vmem:[#allocation8 + $0x60] sm:$0xff] }
  0xcc   : > { %1759 = vmatprep.subr.mxu0 %v1032_v7  ;;  %1794 = vmatprep.subr.mxu1 %v1064_v8  ;;  %v1033_v6 = vld [vmem:[#allocation8 + $0x100] sm:$0xff]  ;;  %v1096_v7 = vld [vmem:[#allocation8 + $0x2f8] sm:$0xff] }
  0xcd   : > { %1760 = vmatpush3.msra.mxu0 %v1016_v9  ;;  %1795 = vmatpush3.msra.mxu1 %v1048_v10  ;;  %v1128_v8 = vld [vmem:[#allocation8 + $0x3f8] sm:$0xff]  ;;  %v479_v9 = vlaneseq }
  0xce   : > { %1761 = vmatprep.subr.mxu0 %v1031_v11  ;;  %1796 = vmatprep.subr.mxu1 %v1063_v12 }
  0xcf   : > { %1762 = vmatpush3.msra.mxu0 %v1015_v13  ;;  %1797 = vmatpush3.msra.mxu1 %v1047_v14  ;;  %v2436_v10 = vshrl.u32 %v479_v9, 7  ;;  %v2440_v13 = vld [vmem:[#allocation7] sm:$0xff] }
  0xd0   : > { %1763 = vmatprep.subr.mxu0 %v1030_v15  ;;  %1798 = vmatprep.subr.mxu1 %v1062_v16  ;;  %v1103_v9 = vld [vmem:[#allocation8 + $0x330] sm:$0xff] }
  0xd1   : > { %1764 = vmatpush3.msra.mxu0 %v1014_v17  ;;  %1799 = vmatpush3.msra.mxu1 %v1046_v0  ;;  %v481_v11 = vsub.s32 0, %v2436_v10  ;;  %v489_v12 = vsub.s32 2, %v2436_v10  ;;  %v485_v14 = vsub.s32 1, %v2436_v10  ;;  %v493_v15 = vsub.s32 3, %v2436_v10 }
  0xd2   : > { %1765 = vmatprep.subr.mxu0 %v1029_v18  ;;  %1800 = vmatprep.subr.mxu1 %v1061_v19 }
  0xd3   : > { %1766 = vmatpush3.msra.mxu0 %v1013_v2  ;;  %1801 = vmatpush3.msra.mxu1 %v1045_v20  ;;  %v482_v16 = vrot.slane %v2440_v13, %v481_v11  ;;  %v490_v17 = vrot.slane %v2440_v13, %v489_v12  ;;  %v486_v19 = vrot.slane %v2440_v13, %v485_v14 }
  0xd4   : > { %1767 = vmatprep.subr.mxu0 %v1028_v21  ;;  %1802 = vmatprep.subr.mxu1 %v1060_v22  ;;  %v494_v2 = vrot.slane %v2440_v13, %v493_v15 }
  0xd5   : > { %1768 = vmatpush3.msra.mxu0 %v1012_v23  ;;  %1803 = vmatpush3.msra.mxu1 %v1044_v24 }
  0xd6   : > { %1769 = vmatprep.subr.mxu0 %v1027_v25  ;;  %1804 = vmatprep.subr.mxu1 %v1059_v26 }
  0xd7   : > { %1770 = vmatpush3.msra.mxu0 %v1011_v27  ;;  %1805 = vmatpush3.msra.mxu1 %v1043_v28 }
  0xd8   : > { %1771 = vmatprep.subr.mxu0 %v1026_v29  ;;  %1806 = vmatprep.subr.mxu1 %v1058_v30 }
  0xd9   : > { %1772 = vmatpush3.msra.mxu0 %v1010_v31  ;;  %1807 = vmatpush3.msra.mxu1 %v1042_v32  ;;  %v1080_v32 = vld [vmem:[#allocation8 + $0x278] sm:$0xff] }
  0xda   : > { %1773 = vmatprep.subr.mxu0 %v1025_v33  ;;  %1808 = vmatprep.subr.mxu1 %v1057_v34  ;;  %v1112_v33 = vld [vmem:[#allocation8 + $0x378] sm:$0xff] }
  0xdb   : > { %1774 = vmatpush3.msra.mxu0 %v1009_v35  ;;  %1809 = vmatpush3.msra.mxu1 %v1041_v36  ;;  %v1095_v36 = vld [vmem:[#allocation8 + $0x2f0] sm:$0xff] }
  0xdc   : > { %1775 = vmatprep.subr.mxu0 %v1024_v37  ;;  %1810 = vmatprep.subr.mxu1 %v1056_v38  ;;  %v1127_v37 = vld [vmem:[#allocation8 + $0x3f0] sm:$0xff] }
  0xdd   : > { %1776 = vmatpush3.msra.mxu0 %v1008_v39  ;;  %1811 = vmatpush3.msra.mxu1 %v1040_v40  ;;  %v1079_v38 = vld [vmem:[#allocation8 + $0x270] sm:$0xff]  ;;  %v1094_v40 = vld [vmem:[#allocation8 + $0x2e8] sm:$0xff] }
  0xde   : > { %1777 = vmatprep.subr.mxu0 %v1023_v41  ;;  %1812 = vmatprep.subr.mxu1 %v1055_v42  ;;  %v1111_v39 = vld [vmem:[#allocation8 + $0x370] sm:$0xff]  ;;  %v1126_v41 = vld [vmem:[#allocation8 + $0x3e8] sm:$0xff] }
  0xdf   : > { %1778 = vmatpush3.msra.mxu0 %v1007_v43  ;;  %1813 = vmatpush3.msra.mxu1 %v1039_v44  ;;  %v1078_v42 = vld [vmem:[#allocation8 + $0x268] sm:$0xff]  ;;  %v1093_v44 = vld [vmem:[#allocation8 + $0x2e0] sm:$0xff] }
  0xe0   : > { %1779 = vmatprep.subr.mxu0 %v1022_v45  ;;  %1814 = vmatprep.subr.mxu1 %v1054_v46  ;;  %v1110_v43 = vld [vmem:[#allocation8 + $0x368] sm:$0xff]  ;;  %v1125_v45 = vld [vmem:[#allocation8 + $0x3e0] sm:$0xff] }
  0xe1   : > { %1780 = vmatpush3.msra.mxu0 %v1006_v47  ;;  %1815 = vmatpush3.msra.mxu1 %v1038_v48  ;;  %v1077_v46 = vld [vmem:[#allocation8 + $0x260] sm:$0xff]  ;;  %v1092_v48 = vld [vmem:[#allocation8 + $0x2d8] sm:$0xff] }
  0xe2   : > { %1781 = vmatprep.subr.mxu0 %v1021_v49  ;;  %1816 = vmatprep.subr.mxu1 %v1053_v50  ;;  %v1109_v47 = vld [vmem:[#allocation8 + $0x360] sm:$0xff]  ;;  %v1124_v49 = vld [vmem:[#allocation8 + $0x3d8] sm:$0xff] }
  0xe3   : > { %1782 = vmatpush3.msra.mxu0 %v1005_v51  ;;  %1817 = vmatpush3.msra.mxu1 %v1037_v52  ;;  %v1076_v50 = vld [vmem:[#allocation8 + $0x258] sm:$0xff]  ;;  %v1091_v52 = vld [vmem:[#allocation8 + $0x2d0] sm:$0xff] }
  0xe4   : > { %1783 = vmatprep.subr.mxu0 %v1020_v53  ;;  %1818 = vmatprep.subr.mxu1 %v1052_v54  ;;  %v1108_v51 = vld [vmem:[#allocation8 + $0x358] sm:$0xff]  ;;  %v1123_v53 = vld [vmem:[#allocation8 + $0x3d0] sm:$0xff] }
  0xe5   : > { %1784 = vmatpush3.msra.mxu0 %v1004_v55  ;;  %1819 = vmatpush3.msra.mxu1 %v1036_v56  ;;  %v1075_v54 = vld [vmem:[#allocation8 + $0x250] sm:$0xff]  ;;  %v1090_v56 = vld [vmem:[#allocation8 + $0x2c8] sm:$0xff] }
  0xe6   : > { %1785 = vmatprep.subr.mxu0 %v1019_v57  ;;  %1820 = vmatprep.subr.mxu1 %v1051_v58  ;;  %v1107_v55 = vld [vmem:[#allocation8 + $0x350] sm:$0xff]  ;;  %v1122_v57 = vld [vmem:[#allocation8 + $0x3c8] sm:$0xff] }
  0xe7   : > { %1786 = vmatpush3.msra.mxu0 %v1003_v59  ;;  %1821 = vmatpush3.msra.mxu1 %v1035_v60  ;;  %v1074_v58 = vld [vmem:[#allocation8 + $0x248] sm:$0xff]  ;;  %v1089_v60 = vld [vmem:[#allocation8 + $0x2c0] sm:$0xff] }
  0xe8   : > { %1787 = vmatprep.subr.mxu0 %v1018_v61  ;;  %1822 = vmatprep.subr.mxu1 %v1050_v62  ;;  %v1106_v59 = vld [vmem:[#allocation8 + $0x348] sm:$0xff]  ;;  %v1121_v61 = vld [vmem:[#allocation8 + $0x3c0] sm:$0xff] }
  0xe9   : > { %1788 = vmatpush3.msra.mxu0 %v1002_v63  ;;  %1823 = vmatpush3.msra.mxu1 %v1034_v1  ;;  %v1073_v62 = vld [vmem:[#allocation8 + $0x240] sm:$0xff]  ;;  %v1088_v1 = vld [vmem:[#allocation8 + $0x2b8] sm:$0xff] }
  0xea   : > { %1789 = vmatprep.subr.mxu0 %v1017_v3  ;;  %1824 = vmatprep.subr.mxu1 %v1049_v4  ;;  %v1105_v63 = vld [vmem:[#allocation8 + $0x340] sm:$0xff]  ;;  %v1120_v3 = vld [vmem:[#allocation8 + $0x3b8] sm:$0xff] }
  0xeb   : > { %1790 = vmatpush3.msra.mxu0 %v1001_v5  ;;  %1825 = vmatpush3.msra.mxu1 %v1033_v6  ;;  %v1072_v4 = vld [vmem:[#allocation8 + $0x238] sm:$0xff]  ;;  %v1087_v6 = vld [vmem:[#allocation8 + $0x2b0] sm:$0xff] }
  0xec   : > { %1829 = vmatprep.subr.mxu0 %v1096_v7  ;;  %1864 = vmatprep.subr.mxu1 %v1128_v8  ;;  %v1104_v5 = vld [vmem:[#allocation8 + $0x338] sm:$0xff]  ;;  %v1119_v7 = vld [vmem:[#allocation8 + $0x3b0] sm:$0xff] }
  0xed   : > { %v1071_v8 = vld [vmem:[#allocation8 + $0x230] sm:$0xff] }
 0x147   : > { %v605_v0 = vpop.f32.mrf.mxu0  ;;  %v676_v18 = vpop.f32.mrf.mxu1 }
 0x148   : > { %v606_v20 = vadd.f32 %v605_v0, %v482_v16  ;;  %v677_v21 = vadd.f32 %v676_v18, %v490_v17  ;;  %v1086_v16 = vld [vmem:[#allocation8 + $0x2a8] sm:$0xff]  ;;  %v497_v0 = vsub.s32 4, %v2436_v10  ;;  %v505_v18 = vsub.s32 6, %v2436_v10 }
 0x149   : > { %v607_v22 = vpop.f32.mrf.mxu0  ;;  %v678_v23 = vpop.f32.mrf.mxu1  ;;  %v1118_v17 = vld [vmem:[#allocation8 + $0x3a8] sm:$0xff] }
 0x14a   : > { %v608_v24 = vadd.f32 %v607_v22, %v486_v19  ;;  %v679_v25 = vadd.f32 %v678_v23, %v494_v2  ;;  %vm965_vm0 = vcmp.gt.f32.partialorder %v606_v20, 0.0  ;;  %v977_v26 = vmul.f32 0.01, %v606_v20  ;;  %v1070_v19 = vld [vmem:[#allocation8 + $0x228] sm:$0xff]  ;;  %v1069_v22 = vld [vmem:[#allocation8 + $0x220] sm:$0xff] }
 0x14b   : > { %vm967_vm1 = vcmp.gt.f32.partialorder %v677_v21, 0.0  ;;  %v979_v27 = vmul.f32 0.01, %v677_v21  ;;  %v1102_v2 = vld [vmem:[#allocation8 + $0x328] sm:$0xff]  ;;  %v1101_v23 = vld [vmem:[#allocation8 + $0x320] sm:$0xff] }
 0x14c   : > { %v978_v28 = vmul.f32 0.01, %v608_v24  ;;  %v980_v29 = vmul.f32 0.01, %v679_v25  ;;  %vm966_vm2 = vcmp.gt.f32.partialorder %v608_v24, 0.0  ;;  %vm968_vm3 = vcmp.gt.f32.partialorder %v679_v25, 0.0 }
 0x14d   : > { %v989_v34 = vsel %vm965_vm0, %v606_v20, %v977_v26  ;;  %v991_v35 = vsel %vm967_vm1, %v677_v21, %v979_v27  ;;  %v1085_v20 = vld [vmem:[#allocation8 + $0x2a0] sm:$0xff]  ;;  %v498_v26 = vrot.slane %v2440_v13, %v497_v0  ;;  %v506_v27 = vrot.slane %v2440_v13, %v505_v18 }
 0x14e   : > { %v990_v30 = vsel %vm966_vm2, %v608_v24, %v978_v28  ;;  %v992_v31 = vsel %vm968_vm3, %v679_v25, %v980_v29  ;;  %v1117_v21 = vld [vmem:[#allocation8 + $0x3a0] sm:$0xff]  ;;  %v501_v24 = vsub.s32 5, %v2436_v10  ;;  %v509_v25 = vsub.s32 7, %v2436_v10  ;;  %v1084_v28 = vld [vmem:[#allocation8 + $0x298] sm:$0xff] }
 0x14f   : > { %1264 = vmatprep.mubr.f32.mxu0 %v990_v30  ;;  %1334 = vmatprep.mubr.f32.mxu1 %v992_v31  ;;  %v1116_v29 = vld [vmem:[#allocation8 + $0x398] sm:$0xff]  ;;  %v1189_v0 = vld [vmem:[#allocation8 + $0x5e0] sm:$0xff] }
 0x150   : > { %1265 = vmatmul.mubr.f32.vlgmr.msra.gmra.mxu0 %v989_v34  ;;  %1335 = vmatmul.mubr.f32.vlgmr.msra.gmra.mxu1 %v991_v35  ;;  %v1068_v30 = vld [vmem:[#allocation8 + $0x218] sm:$0xff]  ;;  %v1141_v18 = vld [vmem:[#allocation8 + $0x460] sm:$0xff] }
 0x151   : > { %1830 = vmatpush3.msra.mxu0 %v1080_v32  ;;  %1865 = vmatpush3.msra.mxu1 %v1112_v33  ;;  %v1100_v31 = vld [vmem:[#allocation8 + $0x318] sm:$0xff]  ;;  %v1083_v32 = vld [vmem:[#allocation8 + $0x290] sm:$0xff] }
 0x152   : > { %1831 = vmatprep.subr.mxu0 %v1095_v36  ;;  %1866 = vmatprep.subr.mxu1 %v1127_v37  ;;  %v1115_v33 = vld [vmem:[#allocation8 + $0x390] sm:$0xff]  ;;  %v502_v36 = vrot.slane %v2440_v13, %v501_v24  ;;  %v510_v37 = vrot.slane %v2440_v13, %v509_v25 }
 0x153   : > { %1832 = vmatpush3.msra.mxu0 %v1079_v38  ;;  %1867 = vmatpush3.msra.mxu1 %v1111_v39  ;;  %v1067_v38 = vld [vmem:[#allocation8 + $0x210] sm:$0xff] }
 0x154   : > { %1833 = vmatprep.subr.mxu0 %v1094_v40  ;;  %1868 = vmatprep.subr.mxu1 %v1126_v41  ;;  %v1099_v39 = vld [vmem:[#allocation8 + $0x310] sm:$0xff] }
 0x155   : > { %1834 = vmatpush3.msra.mxu0 %v1078_v42  ;;  %1869 = vmatpush3.msra.mxu1 %v1110_v43  ;;  %v1082_v42 = vld [vmem:[#allocation8 + $0x288] sm:$0xff]  ;;  %v1187_v24 = vld [vmem:[#allocation8 + $0x5d0] sm:$0xff] }
 0x156   : > { %1835 = vmatprep.subr.mxu0 %v1093_v44  ;;  %1870 = vmatprep.subr.mxu1 %v1125_v45  ;;  %v1114_v43 = vld [vmem:[#allocation8 + $0x388] sm:$0xff]  ;;  %v1139_v25 = vld [vmem:[#allocation8 + $0x450] sm:$0xff] }
 0x157   : > { %1836 = vmatpush3.msra.mxu0 %v1077_v46  ;;  %1871 = vmatpush3.msra.mxu1 %v1109_v47  ;;  %v1066_v46 = vld [vmem:[#allocation8 + $0x208] sm:$0xff] }
 0x158   : > { %1837 = vmatprep.subr.mxu0 %v1092_v48  ;;  %1872 = vmatprep.subr.mxu1 %v1124_v49  ;;  %v1098_v47 = vld [vmem:[#allocation8 + $0x308] sm:$0xff]  ;;  %v1081_v48 = vld [vmem:[#allocation8 + $0x280] sm:$0xff] }
 0x159   : > { %1838 = vmatpush3.msra.mxu0 %v1076_v50  ;;  %1873 = vmatpush3.msra.mxu1 %v1108_v51  ;;  %v1113_v49 = vld [vmem:[#allocation8 + $0x380] sm:$0xff] }
 0x15a   : > { %1839 = vmatprep.subr.mxu0 %v1091_v52  ;;  %1874 = vmatprep.subr.mxu1 %v1123_v53  ;;  %v1065_v50 = vld [vmem:[#allocation8 + $0x200] sm:$0xff]  ;;  %v1160_v53 = vld [vmem:[#allocation8 + $0x4f8] sm:$0xff] }
 0x15b   : > { %1840 = vmatpush3.msra.mxu0 %v1075_v54  ;;  %1875 = vmatpush3.msra.mxu1 %v1107_v55  ;;  %v1097_v52 = vld [vmem:[#allocation8 + $0x300] sm:$0xff]  ;;  %v1192_v54 = vld [vmem:[#allocation8 + $0x5f8] sm:$0xff] }
 0x15c   : > { %1841 = vmatprep.subr.mxu0 %v1090_v56  ;;  %1876 = vmatprep.subr.mxu1 %v1122_v57 }
 0x15d   : > { %1842 = vmatpush3.msra.mxu0 %v1074_v58  ;;  %1877 = vmatpush3.msra.mxu1 %v1106_v59 }
 0x15e   : > { %1843 = vmatprep.subr.mxu0 %v1089_v60  ;;  %1878 = vmatprep.subr.mxu1 %v1121_v61  ;;  %v1144_v61 = vld [vmem:[#allocation8 + $0x478] sm:$0xff] }
 0x15f   : > { %1844 = vmatpush3.msra.mxu0 %v1073_v62  ;;  %1879 = vmatpush3.msra.mxu1 %v1105_v63  ;;  %v1176_v62 = vld [vmem:[#allocation8 + $0x578] sm:$0xff] }
 0x160   : > { %1845 = vmatprep.subr.mxu0 %v1088_v1  ;;  %1880 = vmatprep.subr.mxu1 %v1120_v3  ;;  %v1159_v3 = vld [vmem:[#allocation8 + $0x4f0] sm:$0xff] }
 0x161   : > { %1846 = vmatpush3.msra.mxu0 %v1072_v4  ;;  %1881 = vmatpush3.msra.mxu1 %v1104_v5  ;;  %v1191_v4 = vld [vmem:[#allocation8 + $0x5f0] sm:$0xff] }
 0x162   : > { %1847 = vmatprep.subr.mxu0 %v1087_v6  ;;  %1882 = vmatprep.subr.mxu1 %v1119_v7  ;;  %v1143_v5 = vld [vmem:[#allocation8 + $0x470] sm:$0xff]  ;;  %v1158_v7 = vld [vmem:[#allocation8 + $0x4e8] sm:$0xff] }
 0x163   : > { %1848 = vmatpush3.msra.mxu0 %v1071_v8  ;;  %1883 = vmatpush3.msra.mxu1 %v1103_v9  ;;  %v1175_v6 = vld [vmem:[#allocation8 + $0x570] sm:$0xff]  ;;  %v1190_v8 = vld [vmem:[#allocation8 + $0x5e8] sm:$0xff] }
 0x164   : > { %1849 = vmatprep.subr.mxu0 %v1086_v16  ;;  %1884 = vmatprep.subr.mxu1 %v1118_v17  ;;  %v1142_v9 = vld [vmem:[#allocation8 + $0x468] sm:$0xff]  ;;  %v1157_v17 = vld [vmem:[#allocation8 + $0x4e0] sm:$0xff] }
 0x165   : > { %1850 = vmatpush3.msra.mxu0 %v1070_v19  ;;  %1885 = vmatpush3.msra.mxu1 %v1102_v2  ;;  %v1174_v16 = vld [vmem:[#allocation8 + $0x568] sm:$0xff]  ;;  %v1173_v19 = vld [vmem:[#allocation8 + $0x560] sm:$0xff]  ;;  %v1156_v2 = vld [vmem:[#allocation8 + $0x4d8] sm:$0xff] }
 0x166   : > { %1851 = vmatprep.subr.mxu0 %v1085_v20  ;;  %1886 = vmatprep.subr.mxu1 %v1117_v21  ;;  %v1188_v20 = vld [vmem:[#allocation8 + $0x5d8] sm:$0xff] }
 0x167   : > { %1852 = vmatpush3.msra.mxu0 %v1069_v22  ;;  %1887 = vmatpush3.msra.mxu1 %v1101_v23  ;;  %v1140_v21 = vld [vmem:[#allocation8 + $0x458] sm:$0xff]  ;;  %v1155_v23 = vld [vmem:[#allocation8 + $0x4d0] sm:$0xff] }
 0x168   : > { %1853 = vmatprep.subr.mxu0 %v1084_v28  ;;  %1888 = vmatprep.subr.mxu1 %v1116_v29  ;;  %v1172_v22 = vld [vmem:[#allocation8 + $0x558] sm:$0xff]  ;;  %v1186_v28 = vld [vmem:[#allocation8 + $0x5c8] sm:$0xff] }
 0x169   : > { %v747_v34 = vpop.f32.mrf.mxu0  ;;  %v818_v35 = vpop.f32.mrf.mxu1  ;;  %1854 = vmatpush3.msra.mxu0 %v1068_v30  ;;  %1889 = vmatpush3.msra.mxu1 %v1100_v31  ;;  %v1138_v29 = vld [vmem:[#allocation8 + $0x448] sm:$0xff]  ;;  %v1153_v31 = vld [vmem:[#allocation8 + $0x4c0] sm:$0xff] }
 0x16a   : > { %v748_v40 = vadd.f32 %v747_v34, %v498_v26  ;;  %v819_v41 = vadd.f32 %v818_v35, %v506_v27  ;;  %1855 = vmatprep.subr.mxu0 %v1083_v32  ;;  %1890 = vmatprep.subr.mxu1 %v1115_v33  ;;  %v1171_v26 = vld [vmem:[#allocation8 + $0x550] sm:$0xff]  ;;  %v1154_v27 = vld [vmem:[#allocation8 + $0x4c8] sm:$0xff]  ;;  %v1185_v32 = vld [vmem:[#allocation8 + $0x5c0] sm:$0xff] }
 0x16b   : > { %v749_v44 = vpop.f32.mrf.mxu0  ;;  %v820_v45 = vpop.f32.mrf.mxu1  ;;  %1856 = vmatpush3.msra.mxu0 %v1067_v38  ;;  %1891 = vmatpush3.msra.mxu1 %v1099_v39  ;;  %v1170_v30 = vld [vmem:[#allocation8 + $0x548] sm:$0xff]  ;;  %v1137_v33 = vld [vmem:[#allocation8 + $0x440] sm:$0xff]  ;;  %v1152_v35 = vld [vmem:[#allocation8 + $0x4b8] sm:$0xff] }
 0x16c   : > { %v750_v13 = vadd.f32 %v749_v44, %v502_v36  ;;  %v821_v51 = vadd.f32 %v820_v45, %v510_v37  ;;  %1857 = vmatprep.subr.mxu0 %v1082_v42  ;;  %1892 = vmatprep.subr.mxu1 %v1114_v43  ;;  %vm969_vm4 = vcmp.gt.f32.partialorder %v748_v40, 0.0  ;;  %v981_v55 = vmul.f32 0.01, %v748_v40  ;;  %v1169_v34 = vld [vmem:[#allocation8 + $0x540] sm:$0xff]  ;;  %v1184_v36 = vld [vmem:[#allocation8 + $0x5b8] sm:$0xff]  ;;  %v1151_v39 = vld [vmem:[#allocation8 + $0x4b0] sm:$0xff] }
 0x16d   : > { %vm971_vm5 = vcmp.gt.f32.partialorder %v819_v41, 0.0  ;;  %v983_v56 = vmul.f32 0.01, %v819_v41  ;;  %1858 = vmatpush3.msra.mxu0 %v1066_v46  ;;  %1893 = vmatpush3.msra.mxu1 %v1098_v47  ;;  %v1136_v37 = vld [vmem:[#allocation8 + $0x438] sm:$0xff]  ;;  %v1167_v42 = vld [vmem:[#allocation8 + $0x530] sm:$0xff]  ;;  %v1150_v43 = vld [vmem:[#allocation8 + $0x4a8] sm:$0xff] }
 0x16e   : > { %v982_v57 = vmul.f32 0.01, %v750_v13  ;;  %v984_v58 = vmul.f32 0.01, %v821_v51  ;;  %1859 = vmatprep.subr.mxu0 %v1081_v48  ;;  %1894 = vmatprep.subr.mxu1 %v1113_v49  ;;  %vm970_vm6 = vcmp.gt.f32.partialorder %v750_v13, 0.0  ;;  %vm972_vm7 = vcmp.gt.f32.partialorder %v821_v51, 0.0 }
 0x16f   : > { %1860 = vmatpush3.msra.mxu0 %v1065_v50  ;;  %1895 = vmatpush3.msra.mxu1 %v1097_v52  ;;  %v993_v63 = vsel %vm969_vm4, %v748_v40, %v981_v55  ;;  %v995_v1 = vsel %vm971_vm5, %v819_v41, %v983_v56  ;;  %v1168_v38 = vld [vmem:[#allocation8 + $0x538] sm:$0xff]  ;;  %v1183_v40 = vld [vmem:[#allocation8 + $0x5b0] sm:$0xff]  ;;  %v1182_v44 = vld [vmem:[#allocation8 + $0x5a8] sm:$0xff] }
 0x170   : > { %v994_v59 = vsel %vm970_vm6, %v750_v13, %v982_v57  ;;  %v996_v60 = vsel %vm972_vm7, %v821_v51, %v984_v58  ;;  %1899 = vmatprep.subr.mxu0 %v1160_v53  ;;  %1934 = vmatprep.subr.mxu1 %v1192_v54  ;;  %v1135_v41 = vld [vmem:[#allocation8 + $0x430] sm:$0xff]  ;;  %v1134_v45 = vld [vmem:[#allocation8 + $0x428] sm:$0xff]  ;;  %v476_v47 = vld [vmem:[#allocation7 + $0x8] sm:$0xf] }
 0x171   : > { %1404 = vmatprep.mubr.f32.mxu0 %v994_v59  ;;  %1474 = vmatprep.mubr.f32.mxu1 %v996_v60  ;;  %v1166_v46 = vld [vmem:[#allocation8 + $0x528] sm:$0xff]  ;;  %v1149_v48 = vld [vmem:[#allocation8 + $0x4a0] sm:$0xff]  ;;  %v514_v51 = vrot.slane %v476_v47, %v481_v11  ;;  %v522_v52 = vrot.slane %v476_v47, %v489_v12  ;;  %v1148_v53 = vld [vmem:[#allocation8 + $0x498] sm:$0xff]  ;;  %v518_v11 = vrot.slane %v476_v47, %v485_v14 }
 0x172   : > { %1405 = vmatmul.mubr.f32.vlgmr.msra.gmra.mxu0 %v993_v63  ;;  %1475 = vmatmul.mubr.f32.vlgmr.msra.gmra.mxu1 %v995_v1  ;;  %v1181_v49 = vld [vmem:[#allocation8 + $0x5a0] sm:$0xff]  ;;  %v1180_v54 = vld [vmem:[#allocation8 + $0x598] sm:$0xff]  ;;  %v1147_v57 = vld [vmem:[#allocation8 + $0x490] sm:$0xff]  ;;  %v526_v12 = vrot.slane %v476_v47, %v493_v15 }
 0x173   : > { %1900 = vmatpush3.msra.mxu0 %v1144_v61  ;;  %1935 = vmatpush3.msra.mxu1 %v1176_v62  ;;  %v1133_v50 = vld [vmem:[#allocation8 + $0x420] sm:$0xff]  ;;  %v1132_v55 = vld [vmem:[#allocation8 + $0x418] sm:$0xff]  ;;  %v1179_v58 = vld [vmem:[#allocation8 + $0x590] sm:$0xff] }
 0x174   : > { %1901 = vmatprep.subr.mxu0 %v1159_v3  ;;  %1936 = vmatprep.subr.mxu1 %v1191_v4  ;;  %v1165_v13 = vld [vmem:[#allocation8 + $0x520] sm:$0xff]  ;;  %v1164_v56 = vld [vmem:[#allocation8 + $0x518] sm:$0xff]  ;;  %v1131_v61 = vld [vmem:[#allocation8 + $0x410] sm:$0xff] }
 0x175   : > { %1902 = vmatpush3.msra.mxu0 %v1143_v5  ;;  %1937 = vmatpush3.msra.mxu1 %v1175_v6  ;;  %v1163_v62 = vld [vmem:[#allocation8 + $0x510] sm:$0xff]  ;;  %v1146_v3 = vld [vmem:[#allocation8 + $0x488] sm:$0xff]  ;;  %v1145_v14 = vld [vmem:[#allocation8 + $0x480] sm:$0xff] }
 0x176   : > { %1903 = vmatprep.subr.mxu0 %v1158_v7  ;;  %1938 = vmatprep.subr.mxu1 %v1190_v8  ;;  %v1178_v4 = vld [vmem:[#allocation8 + $0x588] sm:$0xff] }
 0x177   : > { %1904 = vmatpush3.msra.mxu0 %v1142_v9  ;;  %1939 = vmatpush3.msra.mxu1 %v1174_v16  ;;  %v1130_v7 = vld [vmem:[#allocation8 + $0x408] sm:$0xff]  ;;  %v1177_v9 = vld [vmem:[#allocation8 + $0x580] sm:$0xff] }
 0x178   : > { %1905 = vmatprep.subr.mxu0 %v1157_v17  ;;  %1940 = vmatprep.subr.mxu1 %v1189_v0  ;;  %v1162_v8 = vld [vmem:[#allocation8 + $0x508] sm:$0xff]  ;;  %v1129_v16 = vld [vmem:[#allocation8 + $0x400] sm:$0xff] }
 0x179   : > { %1906 = vmatpush3.msra.mxu0 %v1141_v18  ;;  %1941 = vmatpush3.msra.mxu1 %v1173_v19  ;;  %v1161_v17 = vld [vmem:[#allocation8 + $0x500] sm:$0xff] }
 0x17a   : > { %1907 = vmatprep.subr.mxu0 %v1156_v2  ;;  %1942 = vmatprep.subr.mxu1 %v1188_v20 }
 0x17b   : > { %1908 = vmatpush3.msra.mxu0 %v1140_v21  ;;  %1943 = vmatpush3.msra.mxu1 %v1172_v22 }
 0x17c   : > { %1909 = vmatprep.subr.mxu0 %v1155_v23  ;;  %1944 = vmatprep.subr.mxu1 %v1187_v24 }
 0x17d   : > { %1910 = vmatpush3.msra.mxu0 %v1139_v25  ;;  %1945 = vmatpush3.msra.mxu1 %v1171_v26 }
 0x17e   : > { %1911 = vmatprep.subr.mxu0 %v1154_v27  ;;  %1946 = vmatprep.subr.mxu1 %v1186_v28 }
 0x17f   : > { %1912 = vmatpush3.msra.mxu0 %v1138_v29  ;;  %1947 = vmatpush3.msra.mxu1 %v1170_v30  ;;  %v1754_v29 = vld [vmem:[%s2526_s4] ss:$0 sm:$0xff] }
 0x180   : > { %1913 = vmatprep.subr.mxu0 %v1153_v31  ;;  %1948 = vmatprep.subr.mxu1 %v1185_v32 }
 0x181   : > { %1914 = vmatpush3.msra.mxu0 %v1137_v33  ;;  %1949 = vmatpush3.msra.mxu1 %v1169_v34 }
 0x182   : > { %1915 = vmatprep.subr.mxu0 %v1152_v35  ;;  %1950 = vmatprep.subr.mxu1 %v1184_v36 }
 0x183   : > { %1916 = vmatpush3.msra.mxu0 %v1136_v37  ;;  %1951 = vmatpush3.msra.mxu1 %v1168_v38 }
 0x184   : > { %1917 = vmatprep.subr.mxu0 %v1151_v39  ;;  %1952 = vmatprep.subr.mxu1 %v1183_v40 }
 0x185   : > { %1918 = vmatpush3.msra.mxu0 %v1135_v41  ;;  %1953 = vmatpush3.msra.mxu1 %v1167_v42 }
 0x186   : > { %1919 = vmatprep.subr.mxu0 %v1150_v43  ;;  %1954 = vmatprep.subr.mxu1 %v1182_v44 }
 0x187   : > { %1920 = vmatpush3.msra.mxu0 %v1134_v45  ;;  %1955 = vmatpush3.msra.mxu1 %v1166_v46 }
 0x188   : > { %1921 = vmatprep.subr.mxu0 %v1149_v48  ;;  %1956 = vmatprep.subr.mxu1 %v1181_v49 }
 0x189   : > { %1922 = vmatpush3.msra.mxu0 %v1133_v50  ;;  %1957 = vmatpush3.msra.mxu1 %v1165_v13 }
 0x18a   : > { %1923 = vmatprep.subr.mxu0 %v1148_v53  ;;  %1958 = vmatprep.subr.mxu1 %v1180_v54 }
 0x18b   : > { %v889_v59 = vpop.f32.mrf.mxu0  ;;  %v960_v60 = vpop.f32.mrf.mxu1  ;;  %1924 = vmatpush3.msra.mxu0 %v1132_v55  ;;  %1959 = vmatpush3.msra.mxu1 %v1164_v56 }
 0x18c   : > { %v890_v63 = vadd.f32 %v889_v59, %v514_v51  ;;  %v961_v1 = vadd.f32 %v960_v60, %v522_v52  ;;  %1925 = vmatprep.subr.mxu0 %v1147_v57  ;;  %1960 = vmatprep.subr.mxu1 %v1179_v58 }
 0x18d   : > { %v891_v5 = vpop.f32.mrf.mxu0  ;;  %v962_v6 = vpop.f32.mrf.mxu1  ;;  %1926 = vmatpush3.msra.mxu0 %v1131_v61  ;;  %1961 = vmatpush3.msra.mxu1 %v1163_v62 }
 0x18e   : > { %v892_v10 = vadd.f32 %v891_v5, %v518_v11  ;;  %v963_v15 = vadd.f32 %v962_v6, %v526_v12  ;;  %1927 = vmatprep.subr.mxu0 %v1146_v3  ;;  %1962 = vmatprep.subr.mxu1 %v1178_v4  ;;  %vm973_vm8 = vcmp.gt.f32.partialorder %v890_v63, 0.0  ;;  %v985_v0 = vmul.f32 0.01, %v890_v63 }
 0x18f   : > { %vm975_vm9 = vcmp.gt.f32.partialorder %v961_v1, 0.0  ;;  %v987_v18 = vmul.f32 0.01, %v961_v1  ;;  %1928 = vmatpush3.msra.mxu0 %v1130_v7  ;;  %1963 = vmatpush3.msra.mxu1 %v1162_v8 }
 0x190   : > { %v986_v19 = vmul.f32 0.01, %v892_v10  ;;  %v988_v2 = vmul.f32 0.01, %v963_v15  ;;  %1929 = vmatprep.subr.mxu0 %v1145_v14  ;;  %1964 = vmatprep.subr.mxu1 %v1177_v9  ;;  %vm974_vm10 = vcmp.gt.f32.partialorder %v892_v10, 0.0  ;;  %vm976_vm11 = vcmp.gt.f32.partialorder %v963_v15, 0.0 }
 0x191   : > { %1930 = vmatpush3.msra.mxu0 %v1129_v16  ;;  %1965 = vmatpush3.msra.mxu1 %v1161_v17  ;;  %v997_v22 = vsel %vm973_vm8, %v890_v63, %v985_v0  ;;  %v999_v23 = vsel %vm975_vm9, %v961_v1, %v987_v18 }
 0x192   : > { %v998_v20 = vsel %vm974_vm10, %v892_v10, %v986_v19  ;;  %v1000_v21 = vsel %vm976_vm11, %v963_v15, %v988_v2 }
 0x193   : > { %1544 = vmatprep.mubr.f32.mxu0 %v998_v20  ;;  %1614 = vmatprep.mubr.f32.mxu1 %v1000_v21 }
 0x194   : > { %1545 = vmatmul.mubr.f32.vlgmr.msra.gmra.mxu0 %v997_v22  ;;  %1615 = vmatmul.mubr.f32.vlgmr.msra.gmra.mxu1 %v999_v23 }
 0x210   : > { %v1791_v24 = vpop.f32.mrf.mxu0  ;;  %v1826_v26 = vpop.f32.mrf.mxu1 }
 0x212   : > { %v1792_v25 = vpop.f32.mrf.mxu0  ;;  %v1827_v30 = vpop.f32.mrf.mxu1 }
 0x213   : > { %v1793_v28 = vadd.f32 %v1792_v25, %v1791_v24  ;;  %v1828_v34 = vadd.f32 %v1827_v30, %v1826_v26 }
 0x215   : > { %v1267_v32 = vadd.f32 %v1793_v28, %v1754_v29 }
 0x217   : > { %v1337_v36 = vadd.f32 %v1828_v34, %v1267_v32 }
 0x232   : > { %v1861_v27 = vpop.f32.mrf.mxu0  ;;  %v1896_v33 = vpop.f32.mrf.mxu1 }
 0x234   : > { %v1862_v31 = vpop.f32.mrf.mxu0  ;;  %v1897_v37 = vpop.f32.mrf.mxu1 }
 0x235   : > { %v1863_v35 = vadd.f32 %v1862_v31, %v1861_v27  ;;  %v1898_v41 = vadd.f32 %v1897_v37, %v1896_v33 }
 0x237   : > { %v1407_v38 = vadd.f32 %v1863_v35, %v1337_v36 }
 0x239   : > { %v1477_v44 = vadd.f32 %v1898_v41, %v1407_v38 }
 0x254   : > { %v1931_v39 = vpop.f32.mrf.mxu0  ;;  %v1966_v40 = vpop.f32.mrf.mxu1 }
 0x256   : > { %v1932_v42 = vpop.f32.mrf.mxu0  ;;  %v1967_v43 = vpop.f32.mrf.mxu1 }
 0x257   : > { %v1933_v45 = vadd.f32 %v1932_v42, %v1931_v39  ;;  %v1968_v47 = vadd.f32 %v1967_v43, %v1966_v40 }
 0x259   : > { %v1547_v46 = vadd.f32 %v1933_v45, %v1477_v44 }
 0x25b   : > { %v1617_v48 = vadd.f32 %v1968_v47, %v1547_v46 }
 0x25d   : > { %v1620_v49 = vsub.f32 0.0, %v1617_v48 }
 0x25f   : > { %v1621_v50 = vmul.f32 1.442695, %v1620_v49 }
 0x261   : > { %2051 = vpow2.f32 %v1621_v50 }
 0x26e   : > { %v2052_v13 = vpop.eup %2051 }
 0x26f   : > { %v1623_v51 = vadd.f32 1.0, %v2052_v13 }
 0x271   : > { %2053 = vrcp.f32 %v1623_v51 }
 0x27e   : > { %v2054_v52 = vpop.eup %2053 }
 0x27f   : > { %1626 = vst [vmem:[%s281_s17] sm:$0xff] %v2054_v52 }
 0x280   : > { %2174 = shalt.err (!%p2171_p9)
}
 0x281   : > { %s2175_s30 = scalar_lea.hbm %s2485_s8, 128  ;;  %s2179_s9 = scalar_lea.hbm %s2527_s5, 256 }
 0x282   : > { %p2176_p13 = scmp.ne.s32.totalorder %s2485_s8, %s2175_s30  ;;  %p2180_p11 = scmp.lt.s32.totalorder %s2485_s8, %s2527_s5 }
 0x283   : > { %p2181_p1 = scmp.lt.s32.totalorder %s2179_s9, %s2175_s30 }
 0x284   : > { %p2177_p8 = pnand %p2176_p13, %p2545_p6 }
 0x285   : > { %p2182_p2 = por %p2181_p1, %p2180_p11 }
 0x286   : > { %p2178_p10 = pneg %p2177_p8 }
 0x288   : > { %p2183_p4 = pnand %p2182_p2, %p2178_p10 }
 0x28a   : > { %2186 = shalt.err (!%p2183_p4)
}
 0x28b   : > { %1983 = dma.vmem_to_hbm [thread:$0]  (%p2545_p6), %s1642_s23, 128, %s2485_s8, %s1628_s13  }
 0x28c PF: > { %s1653_s15 = sand.u32 1, %s2221_s18   ;;  %p2546_p12 = scmp.ne.s32.totalorder %s2533_s25, 0 }
 0x28d   : > { %p2547_p0 = scmp.ge.s32.totalorder %s2233_s21, 2  ;;  %s1654_s17 = scalar_lea.sflag [#allocation4], %s1653_s15 }
 0x28f   : > { %p2000_p5 = pnand %p2547_p0, %p2546_p12 }
 0x291   : > { %p2001_p3 = pneg %p2000_p5 }
 0x293   : > { %2216 = dma.done.wait (%p2001_p3), %s1654_s17, 128  }
 0x294   : > { %2218 = vsyncadd (%p2001_p3), %s1654_s17, 4294967168  ;;  %p20_p7 = scmp.ge.s32.totalorder %s2355_s6, 4   ;;  %s2548_s18 = smov %s2225_s19 }
 0x295   : > { %s2549_s19 = smov %s2229_s20  ;;  %s2550_s20 = smov %s2365_s10 }
 0x296   : > { %s2551_s21 = smov %s2355_s6  ;;  %22 = sbr.rel (!%p20_p7) target bundleno = 7 (0x7), region = 97 }
 0x29b   :  { %1659 = vsyncpa [#allocation3], 1 }
 0x29c   :  { %1661 = vsyncpa [#allocation3 + $0x1], 1 }
 0x29d   :  { %1662 = vsyncpa [#allocation6], 1 }
 0x29e   :  { %1663 = vsyncpa [#allocation9], 1 }
 0x29f   :  { %1664 = vsyncpa [#allocation4], 1 }
 0x2a0   :  { %1666 = vsyncpa [#allocation4 + $0x1], 1 }

</bundles_post_ra>
